<compile_context>
chip_gen: v7x
topology: tpu7x:2x2x1
jax: 0.10.0
libtpu: 0.0.40
codegen_flags: <defaults>
</compile_context>

<pallas_src>
import jax
import jax.numpy as jnp
from jax.experimental import pallas as pl
from jax.experimental.pallas import tpu as pltpu


# -----------------------------------------------------------------------------
# Fused kernel.  grid = (M/tm, K/tk); K (fc1 reduction) is the last, "arbitrary"
# axis.  Per step: h1_acc += x_tile @ w1_tile (bf16 in, f32 MXU accumulate).
# On the last K step: bias+ReLU, then fc2+ReLU and fc3 entirely in VMEM.
# -----------------------------------------------------------------------------
def _encoder_fused_kernel(x_ref, w1_ref, w2_ref, w3_ref,
                          b1_ref, b2_ref, b3_ref,
                          o_ref, h1_acc):
    k = pl.program_id(1)

    @pl.when(k == 0)
    def _():
        h1_acc[...] = jnp.zeros_like(h1_acc)

    # fc1 partial product: x and w1 are already bf16 (cast once, outside the
    # kernel); accumulation stays f32 on the MXU.
    h1_acc[...] += jnp.dot(x_ref[...], w1_ref[...],
                           preferred_element_type=jnp.float32)

    @pl.when(k == pl.num_programs(1) - 1)
    def _():
        # fc1 bias + ReLU (f32, in VMEM).
        h1 = jnp.maximum(h1_acc[...] + b1_ref[...], 0.0)
        # fc2 + ReLU (small weights, VMEM-resident, f32).
        h2 = jnp.maximum(
            jnp.dot(h1, w2_ref[...], preferred_element_type=jnp.float32)
            + b2_ref[...],
            0.0,
        )
        # fc3 (no activation).
        o_ref[...] = (
            jnp.dot(h2, w3_ref[...], preferred_element_type=jnp.float32)
            + b3_ref[...]
        ).astype(o_ref.dtype)


# -----------------------------------------------------------------------------
# Tiling / VMEM sizing helpers (run once at parameter-preparation time).
# -----------------------------------------------------------------------------
_TM_CAP = 256  # max batch-tile rows: fewer w1 re-streams than 128, matches MXU


def _round_up(x, m):
    return ((x + m - 1) // m) * m


def _pad2(a, rows, cols):
    return jnp.pad(a, ((0, rows - a.shape[0]), (0, cols - a.shape[1])))


def _tpu_vmem_capacity_bytes():
    """Physical VMEM per TensorCore (128 MiB v5e/v6e, 64 MiB v7x)."""
    try:
        return int(pltpu.get_tpu_info().vmem_capacity_bytes)
    except Exception:
        return 64 * 1024 * 1024  # conservative (v7x-sized) fallback


def _working_set_bytes(tk, tm, n1, n2, n3, w1_itemsize):
    """Conservative per-step VMEM estimate (streamed operands double-buffered)."""
    w1 = 2 * tk * n1 * w1_itemsize                    # w1 tile, double-buffered
    x = 2 * tm * tk * 2                               # bf16 x tile, double-buffered
    acc = tm * n1 * 4                                 # f32 fc1 accumulator scratch
    const = 2 * (n1 * n2 * 4 + n2 * n3 * 4            # w2, w3 (grid-invariant, but
                 + (n1 + n2 + n3) * 4)                #  default double-buffered)
    out = 2 * tm * n3 * 4
    return w1 + x + acc + const + out


def _select_k_tiling(d_in, n1, n2, n3, w1_itemsize):
    """Pick (tk, k_pad, vmem_limit_bytes) from the chip's VMEM capacity."""
    vmem_cap = _tpu_vmem_capacity_bytes()
    budget = int(vmem_cap * 0.70)  # headroom for compiler-internal scratch

    k128 = _round_up(d_in, 128)
    if _working_set_bytes(k128, _TM_CAP, n1, n2, n3, w1_itemsize) <= budget:
        # Small K (demo sizes): whole padded K in one block -> grid K extent 1,
        # zero per-step overhead.
        tk = k128
    else:
        # Huge K (real 600*600*3 input): pick the biggest K tile that fits so
        # the ~0.35us per-step overhead is dwarfed by each w1 tile's DMA.
        # K is padded up to a tk multiple below, so no divisibility constraint
        # (and no silent fallthrough to staging all of w1).
        tk = 256
        for cand in (8192, 4096, 2048, 1024, 512):
            if _working_set_bytes(cand, _TM_CAP, n1, n2, n3, w1_itemsize) <= budget:
                tk = cand
                break

    ws = _working_set_bytes(tk, _TM_CAP, n1, n2, n3, w1_itemsize)
    # Raise the scoped VMEM limit explicitly (defaults: 16 MiB v5e, 32 MiB
    # v6e/v7x) but stay well inside physical capacity.
    vmem_limit = min(int(vmem_cap * 0.75), max(2 * ws, 32 * 1024 * 1024))
    return tk, _round_up(d_in, tk), vmem_limit


# -----------------------------------------------------------------------------
# One-time parameter preparation (NOT in the forward path): transpose to
# [in, out], pad feature dims to lane multiples, pad K to a tk multiple,
# cast the large streamed fc1 weight to bf16.
# -----------------------------------------------------------------------------
def prepare_encoder_params(params, w1_dtype=jnp.bfloat16):
    """params: ((w1,b1),(w2,b2),(w3,b3)) in PyTorch [out, in] layout."""
    (w1, b1), (w2, b2), (w3, b3) = params
    d_in, h1, h2, d_out = w1.shape[1], w1.shape[0], w2.shape[0], w3.shape[0]

    n1 = _round_up(h1, 128)      # 1200 -> 1280
    n2 = _round_up(h2, 128)      # 120  -> 128
    n3 = _round_up(d_out, 128)   # 10   -> 128

    w1_itemsize = jnp.dtype(w1_dtype).itemsize
    tk, k_pad, vmem_limit = _select_k_tiling(d_in, n1, n2, n3, w1_itemsize)

    # TODO(synk): on v7x, store w1 as fp8 (e4m3 + per-column scales applied in
    # the epilogue) to halve the dominant HBM stream again; v5e/v6e MXUs have
    # no fp8 path, so bf16 stays the portable choice here.
    return {
        # kernel operands
        "w1": _pad2(jnp.transpose(w1), k_pad, n1).astype(w1_dtype),
        "w2": _pad2(jnp.transpose(w2), n1, n2).astype(jnp.float32),
        "w3": _pad2(jnp.transpose(w3), n2, n3).astype(jnp.float32),
        "b1": _pad2(b1.reshape(1, -1).astype(jnp.float32), 1, n1),
        "b2": _pad2(b2.reshape(1, -1).astype(jnp.float32), 1, n2),
        "b3": _pad2(b3.reshape(1, -1).astype(jnp.float32), 1, n3),
        # static dims / tiling
        "d_in": d_in, "d_out": d_out,
        "k_pad": k_pad, "tk": tk,
        "n1": n1, "n2": n2, "n3": n3,
        "vmem_limit_bytes": vmem_limit,
    }


# -----------------------------------------------------------------------------
# Forward wrapper: pad x (batch -> sublane multiple, features -> k_pad), cast
# to bf16, run the fused kernel once, slice the padding off.
# -----------------------------------------------------------------------------
def encoder_fc_forward(x, prepped):
    m, d_in = x.shape
    assert d_in == prepped["d_in"], "input feature dim mismatch"
    k_pad, tk = prepped["k_pad"], prepped["tk"]
    n1, n2, n3 = prepped["n1"], prepped["n2"], prepped["n3"]

    # Batch tiling: small batches run as one (>=8)-row block; large batches
    # tile at 256 rows (each extra batch tile re-streams the whole w1 from HBM,
    # so bigger tm directly cuts the dominant HBM traffic) and shard across
    # cores via the "parallel" axis.
    if m <= _TM_CAP:
        m_pad = _round_up(m, 8)
        tm = m_pad
    else:
        tm = _TM_CAP
        m_pad = _round_up(m, tm)
    # TODO(synk): on v7x with a single batch tile, additionally split the n1
    # columns of w1 across the two TensorCores (each core streams half of w1,
    # fc2/fc3 epilogue on the fused h1) so the second core's HBM bandwidth
    # isn't idle for inference-sized batches.

    grid = (m_pad // tm, k_pad // tk)

    # Pad, then cast to bf16 in the wrapper: halves the x HBM stream and
    # removes the per-step VPU cast from the kernel body.
    xp = jnp.pad(x.astype(jnp.float32),
                 ((0, m_pad - m), (0, k_pad - d_in))).astype(jnp.bfloat16)

    w1_bytes = int(prepped["w1"].size) * prepped["w1"].dtype.itemsize
    cost = pl.CostEstimate(
        flops=int(2 * m_pad * (k_pad * n1 + n1 * n2 + n2 * n3)),
        transcendentals=0,
        bytes_accessed=int(w1_bytes * (m_pad // tm)      # w1 streamed per batch tile
                           + xp.size * 2                 # bf16 x
                           + m_pad * n3 * 4              # output
                           + (n1 * n2 + n2 * n3 + n1 + n2 + n3) * 4),
    )

    # NOTE: w2/w3/biases have constant index_maps so they are DMA'd once; their
    # default double-buffering (~1.5 MB) is already counted in the VMEM budget,
    # so single-buffering them isn't needed for headroom here.
    out_full = pl.pallas_call(
        _encoder_fused_kernel,
        out_shape=jax.ShapeDtypeStruct((m_pad, n3), jnp.float32),
        grid_spec=pltpu.PrefetchScalarGridSpec(
            num_scalar_prefetch=0,
            grid=grid,
            in_specs=[
                pl.BlockSpec((tm, tk), lambda i, k: (i, k)),   # x (bf16, streamed)
                pl.BlockSpec((tk, n1), lambda i, k: (k, 0)),   # w1 (bf16, streamed over K)
                pl.BlockSpec((n1, n2), lambda i, k: (0, 0)),   # w2 (VMEM-resident)
                pl.BlockSpec((n2, n3), lambda i, k: (0, 0)),   # w3 (VMEM-resident)
                pl.BlockSpec((1, n1), lambda i, k: (0, 0)),    # b1
                pl.BlockSpec((1, n2), lambda i, k: (0, 0)),    # b2
                pl.BlockSpec((1, n3), lambda i, k: (0, 0)),    # b3
            ],
            out_specs=pl.BlockSpec((tm, n3), lambda i, k: (i, 0)),
            scratch_shapes=[pltpu.VMEM((tm, n1), jnp.float32)],  # fc1 accumulator
        ),
        compiler_params=pltpu.CompilerParams(
            dimension_semantics=("parallel", "arbitrary"),
            vmem_limit_bytes=prepped["vmem_limit_bytes"],
        ),
        cost_estimate=cost,
    )(xp, prepped["w1"], prepped["w2"], prepped["w3"],
      prepped["b1"], prepped["b2"], prepped["b3"])

    return out_full[:m, :prepped["d_out"]]


# -----------------------------------------------------------------------------
# Deterministic init mimicking nn.Linear default (U(-1/sqrt(fan_in), +...)).
# -----------------------------------------------------------------------------
def init_params(key, d_in, h1, h2, d_out, dtype=jnp.float32):
    def linear_init(k, fan_out, fan_in):
        kw, kb = jax.random.split(k)
        bound = 1.0 / jnp.sqrt(fan_in)
        w = jax.random.uniform(kw, (fan_out, fan_in), dtype, -bound, bound)
        b = jax.random.uniform(kb, (fan_out,), dtype, -bound, bound)
        return w, b

    k1, k2, k3 = jax.random.split(key, 3)
    return (
        linear_init(k1, h1, d_in),
        linear_init(k2, h2, h1),
        linear_init(k3, d_out, h2),
    )


if __name__ == "__main__":
    # Small shapes consistent with the module's structure:
    # batch=2, flattened image dim = 3*16*16 = 768 (stand-in for 600*600*3),
    # hidden dims exactly as in the module: 1200 -> 120 -> 10.
    B, D_IN, H1, H2, D_OUT = 2, 3 * 16 * 16, 1200, 120, 10

    key = jax.random.PRNGKey(0)
    kx, kp = jax.random.split(key)
    x = jax.random.normal(kx, (B, D_IN), dtype=jnp.float32)
    params = init_params(kp, D_IN, H1, H2, D_OUT)

    prepped = prepare_encoder_params(params, w1_dtype=jnp.bfloat16)
    fwd = jax.jit(lambda xx: encoder_fc_forward(xx, prepped))

    out = jax.block_until_ready(fwd(x))
    assert out.shape == (B, D_OUT) and out.dtype == jnp.float32

    (w1, b1), (w2, b2), (w3, b3) = params

    # Tight check against a reference with the SAME quantization as the kernel
    # (x and fc1 weights routed through bf16, all accumulation in f32).
    xq = x.astype(jnp.bfloat16).astype(jnp.float32)
    w1q = w1.astype(jnp.bfloat16).astype(jnp.float32)
    ref_q = jnp.maximum(xq @ w1q.T + b1, 0.0)
    ref_q = jnp.maximum(ref_q @ w2.T + b2, 0.0)
    ref_q = ref_q @ w3.T + b3
    err_q = float(jnp.max(jnp.abs(out - ref_q)))
    assert jnp.allclose(out, ref_q, atol=1e-3, rtol=1e-3), f"quantized-ref diff {err_q}"

    # Loose check against the pure-f32 module semantics (bf16 fc1 stream
    # introduces a small, bounded perturbation at this K).
    ref = jnp.maximum(x @ w1.T + b1, 0.0)
    ref = jnp.maximum(ref @ w2.T + b2, 0.0)
    ref = ref @ w3.T + b3
    err = float(jnp.max(jnp.abs(out - ref)))
    assert jnp.allclose(out, ref, atol=5e-2, rtol=5e-2), f"f32-ref diff {err}"

    print("KERNEL_OK")
</pallas_src>

<mosaic_0001>
module attributes {stable_mosaic.version = 11 : i64} {
  func.func @_encoder_fused_kernel(%arg0: i32, %arg1: i32, %arg2: memref<8x768xbf16, #tpu.memory_space<vmem>>, %arg3: memref<768x1280xbf16, #tpu.memory_space<vmem>>, %arg4: memref<1280x128xf32, #tpu.memory_space<vmem>>, %arg5: memref<128x128xf32, #tpu.memory_space<vmem>>, %arg6: memref<1x1280xf32, #tpu.memory_space<vmem>>, %arg7: memref<1x128xf32, #tpu.memory_space<vmem>>, %arg8: memref<1x128xf32, #tpu.memory_space<vmem>>, %arg9: memref<8x128xf32, #tpu.memory_space<vmem>>, %arg10: memref<8x1280xf32, #tpu.memory_space<vmem>>) attributes {dimension_semantics = [#tpu.dimension_semantics<parallel>, #tpu.dimension_semantics<arbitrary>], iteration_bounds = array<i64: 1, 1>, scalar_prefetch = 0 : i64, scratch_operands = 1 : i64, tpu.core_type = #tpu.core_type<tc>, window_params = [{transform_indices = @transform_0, window_bounds = array<i64: 8, 768>}, {transform_indices = @transform_1, window_bounds = array<i64: 768, 1280>}, {pipeline_mode = #tpu.pipeline_mode<synchronous>, transform_indices = @transform_2, window_bounds = array<i64: 1280, 128>}, {pipeline_mode = #tpu.pipeline_mode<synchronous>, transform_indices = @transform_3, window_bounds = array<i64: 128, 128>}, {pipeline_mode = #tpu.pipeline_mode<synchronous>, transform_indices = @transform_4, window_bounds = array<i64: 1, 1280>}, {pipeline_mode = #tpu.pipeline_mode<synchronous>, transform_indices = @transform_5, window_bounds = array<i64: 1, 128>}, {pipeline_mode = #tpu.pipeline_mode<synchronous>, transform_indices = @transform_6, window_bounds = array<i64: 1, 128>}, {transform_indices = @transform_7, window_bounds = array<i64: 8, 128>}]} {
    %c0_i32 = arith.constant 0 : i32
    %0 = arith.cmpi eq, %arg1, %c0_i32 : i32
    %1 = arith.extui %0 : i1 to i32
    %c0_i32_0 = arith.constant 0 : i32
    %2 = arith.cmpi ne, %1, %c0_i32_0 : i32
    scf.if %2 {
      %cst_10 = arith.constant 0.000000e+00 : f32
      %12 = vector.broadcast %cst_10 : f32 to vector<8x1280xf32>
      %c0_11 = arith.constant 0 : index
      %c0_12 = arith.constant 0 : index
      %13 = vector.load %arg10[%c0_11, %c0_12] : memref<8x1280xf32, #tpu.memory_space<vmem>>, vector<8x1280xf32>
      tpu.vector_store %arg10[%c0_11, %c0_12], %12 {strides = array<i32>} : memref<8x1280xf32, #tpu.memory_space<vmem>>, vector<8x1280xf32>,
    } else {
    }
    %c0 = arith.constant 0 : index
    %c0_1 = arith.constant 0 : index
    %3 = vector.load %arg10[%c0, %c0_1] : memref<8x1280xf32, #tpu.memory_space<vmem>>, vector<8x1280xf32>
    %c0_2 = arith.constant 0 : index
    %c0_3 = arith.constant 0 : index
    %4 = vector.load %arg2[%c0_2, %c0_3] : memref<8x768xbf16, #tpu.memory_space<vmem>>, vector<8x768xbf16>
    %c0_4 = arith.constant 0 : index
    %c0_5 = arith.constant 0 : index
    %5 = vector.load %arg3[%c0_4, %c0_5] : memref<768x1280xbf16, #tpu.memory_space<vmem>>, vector<768x1280xbf16>
    %cst = arith.constant dense<0.000000e+00> : vector<8x1280xf32>
    %6 = tpu.matmul %4, %5, %cst {dimension_numbers = #tpu.dot_dimension_numbers<[1], [0], [0], [1], [0, 0, 1, 1], [], []>} : vector<8x768xbf16>, vector<768x1280xbf16>, vector<8x1280xf32> -> vector<8x1280xf32>
    %7 = arith.addf %3, %6 : vector<8x1280xf32>
    %c0_6 = arith.constant 0 : index
    %c0_7 = arith.constant 0 : index
    %8 = vector.load %arg10[%c0_6, %c0_7] : memref<8x1280xf32, #tpu.memory_space<vmem>>, vector<8x1280xf32>
    tpu.vector_store %arg10[%c0_6, %c0_7], %7 {strides = array<i32>} : memref<8x1280xf32, #tpu.memory_space<vmem>>, vector<8x1280xf32>,
    %c0_i32_8 = arith.constant 0 : i32
    %9 = arith.cmpi eq, %arg1, %c0_i32_8 : i32
    %10 = arith.extui %9 : i1 to i32
    %c0_i32_9 = arith.constant 0 : i32
    %11 = arith.cmpi ne, %10, %c0_i32_9 : i32
    scf.if %11 {
      %c0_10 = arith.constant 0 : index
      %c0_11 = arith.constant 0 : index
      %12 = vector.load %arg10[%c0_10, %c0_11] : memref<8x1280xf32, #tpu.memory_space<vmem>>, vector<8x1280xf32>
      %c0_12 = arith.constant 0 : index
      %c0_13 = arith.constant 0 : index
      %13 = vector.load %arg6[%c0_12, %c0_13] : memref<1x1280xf32, #tpu.memory_space<vmem>>, vector<1x1280xf32>
      %14 = vector.broadcast %13 : vector<1x1280xf32> to vector<8x1280xf32>
      %15 = arith.addf %12, %14 : vector<8x1280xf32>
      %cst_14 = arith.constant 0.000000e+00 : f32
      %16 = vector.broadcast %cst_14 : f32 to vector<8x1280xf32>
      %17 = arith.maximumf %15, %16 : vector<8x1280xf32>
      %c0_15 = arith.constant 0 : index
      %c0_16 = arith.constant 0 : index
      %18 = vector.load %arg4[%c0_15, %c0_16] : memref<1280x128xf32, #tpu.memory_space<vmem>>, vector<1280x128xf32>
      %cst_17 = arith.constant dense<0.000000e+00> : vector<8x128xf32>
      %19 = tpu.matmul %17, %18, %cst_17 {dimension_numbers = #tpu.dot_dimension_numbers<[1], [0], [0], [1], [0, 0, 1, 1], [], []>} : vector<8x1280xf32>, vector<1280x128xf32>, vector<8x128xf32> -> vector<8x128xf32>
      %c0_18 = arith.constant 0 : index
      %c0_19 = arith.constant 0 : index
      %20 = vector.load %arg7[%c0_18, %c0_19] : memref<1x128xf32, #tpu.memory_space<vmem>>, vector<1x128xf32>
      %21 = vector.broadcast %20 : vector<1x128xf32> to vector<8x128xf32>
      %22 = arith.addf %19, %21 : vector<8x128xf32>
      %cst_20 = arith.constant 0.000000e+00 : f32
      %23 = vector.broadcast %cst_20 : f32 to vector<8x128xf32>
      %24 = arith.maximumf %22, %23 : vector<8x128xf32>
      %c0_21 = arith.constant 0 : index
      %c0_22 = arith.constant 0 : index
      %25 = vector.load %arg5[%c0_21, %c0_22] : memref<128x128xf32, #tpu.memory_space<vmem>>, vector<128x128xf32>
      %cst_23 = arith.constant dense<0.000000e+00> : vector<8x128xf32>
      %26 = tpu.matmul %24, %25, %cst_23 {dimension_numbers = #tpu.dot_dimension_numbers<[1], [0], [0], [1], [0, 0, 1, 1], [], []>} : vector<8x128xf32>, vector<128x128xf32>, vector<8x128xf32> -> vector<8x128xf32>
      %c0_24 = arith.constant 0 : index
      %c0_25 = arith.constant 0 : index
      %27 = vector.load %arg8[%c0_24, %c0_25] : memref<1x128xf32, #tpu.memory_space<vmem>>, vector<1x128xf32>
      %28 = vector.broadcast %27 : vector<1x128xf32> to vector<8x128xf32>
      %29 = arith.addf %26, %28 : vector<8x128xf32>
      %c0_26 = arith.constant 0 : index
      %c0_27 = arith.constant 0 : index
      %30 = vector.load %arg9[%c0_26, %c0_27] : memref<8x128xf32, #tpu.memory_space<vmem>>, vector<8x128xf32>
      tpu.vector_store %arg9[%c0_26, %c0_27], %29 {strides = array<i32>} : memref<8x128xf32, #tpu.memory_space<vmem>>, vector<8x128xf32>,
    } else {
    }
    return
  }
  func.func @transform_0(%arg0: i32, %arg1: i32) -> (i32, i32) {
    %c0_i32 = arith.constant 0 : i32
    return %arg0, %arg1 : i32, i32
  }
  func.func @transform_1(%arg0: i32, %arg1: i32) -> (i32, i32) {
    %c0_i32 = arith.constant 0 : i32
    %c0_i32_0 = arith.constant 0 : i32
    return %arg1, %c0_i32 : i32, i32
  }
  func.func @transform_2(%arg0: i32, %arg1: i32) -> (i32, i32) {
    %c0_i32 = arith.constant 0 : i32
    %c0_i32_0 = arith.constant 0 : i32
    %c0_i32_1 = arith.constant 0 : i32
    return %c0_i32, %c0_i32_0 : i32, i32
  }
  func.func @transform_3(%arg0: i32, %arg1: i32) -> (i32, i32) {
    %c0_i32 = arith.constant 0 : i32
    %c0_i32_0 = arith.constant 0 : i32
    %c0_i32_1 = arith.constant 0 : i32
    return %c0_i32, %c0_i32_0 : i32, i32
  }
  func.func @transform_4(%arg0: i32, %arg1: i32) -> (i32, i32) {
    %c0_i32 = arith.constant 0 : i32
    %c0_i32_0 = arith.constant 0 : i32
    %c0_i32_1 = arith.constant 0 : i32
    return %c0_i32, %c0_i32_0 : i32, i32
  }
  func.func @transform_5(%arg0: i32, %arg1: i32) -> (i32, i32) {
    %c0_i32 = arith.constant 0 : i32
    %c0_i32_0 = arith.constant 0 : i32
    %c0_i32_1 = arith.constant 0 : i32
    return %c0_i32, %c0_i32_0 : i32, i32
  }
  func.func @transform_6(%arg0: i32, %arg1: i32) -> (i32, i32) {
    %c0_i32 = arith.constant 0 : i32
    %c0_i32_0 = arith.constant 0 : i32
    %c0_i32_1 = arith.constant 0 : i32
    return %c0_i32, %c0_i32_0 : i32, i32
  }
  func.func @transform_7(%arg0: i32, %arg1: i32) -> (i32, i32) {
    %c0_i32 = arith.constant 0 : i32
    %c0_i32_0 = arith.constant 0 : i32
    return %arg0, %c0_i32 : i32, i32
  }
}

</mosaic_0001>

<bundles_post_ra>
// kernel: _lambda_.1
= control target key start
LH: loop header
LB: loop body
LE: loop exit
PB: predicated region body
PF: predicated region fallthrough
CT: control target
= control target key end

     0   :  { %vm5921_vm0 = vmmov 0   ;;  %s8075_s1 = inlined_call_operand.vmem [shape: bf16[768,1280], index: 1, kind: input, shape index: {}]   ;;  %s8076_s0 = inlined_call_operand.vmem [shape: bf16[8,768], index: 0, kind: input, shape index: {}]   ;;  %s8077_s4 = inlined_call_operand.vmem [shape: f32[1,1280], index: 4, kind: input, shape index: {}]   ;;  %s8078_s2 = inlined_call_operand.vmem [shape: f32[1280,128], index: 2, kind: input, shape index: {}]   ;;  %s8079_s3 = inlined_call_operand.vmem [shape: f32[128,128], index: 3, kind: input, shape index: {}]   ;;  %s8080_s5 = inlined_call_operand.vmem [shape: f32[1,128], index: 5, kind: input, shape index: {}]   ;;  %s8081_s6 = inlined_call_operand.vmem [shape: f32[1,128], index: 6, kind: input, shape index: {}]   ;;  %s8082_s7 = inlined_call_operand.vmem [shape: f32[8,128], index: 7, kind: output, shape index: {}]  }
   0x1   :  { %v5194_v0 = vld [vmem:[%s8075_s1 + $0x4] ss:$40 sps:$4 sm:$0xff]   ;;  %v5198_v2 = vld [vmem:[%s8075_s1] ss:$40 sps:$4 sm:$0xff]   ;;  %v5200_v4 = vld [vmem:[%s8075_s1 + $0x54] ss:$40 sps:$4 sm:$0xff]  }
   0x2   :  { %v5196_v1 = vld [vmem:[%s8075_s1 + $0x504] ss:$40 sps:$4 sm:$0xff]   ;;  %2954 = vmatprep.subr.bf16.mxu0 %v5194_v0  ;;  %v5199_v3 = vld [vmem:[%s8075_s1 + $0x500] ss:$40 sps:$4 sm:$0xff]   ;;  %v5202_v5 = vld [vmem:[%s8075_s1 + $0x554] ss:$40 sps:$4 sm:$0xff]  }
   0x3   :  { %2995 = vmatprep.subr.bf16.mxu1 %v5196_v1  ;;  %2955 = vmatpush1.bf16.msra.mxu0 %v5198_v2  ;;  %v5204_v6 = vld [vmem:[%s8075_s1 + $0x50] ss:$40 sps:$4 sm:$0xff]   ;;  %v5206_v8 = vld [vmem:[%s8075_s1 + $0xa4] ss:$40 sps:$4 sm:$0xff]   ;;  %v5210_v10 = vld [vmem:[%s8075_s1 + $0xa0] ss:$40 sps:$4 sm:$0xff]  }
   0x4   :  { %2996 = vmatpush1.bf16.msra.mxu1 %v5199_v3  ;;  %2956 = vmatprep.subr.bf16.mxu0 %v5200_v4  ;;  %v5205_v7 = vld [vmem:[%s8075_s1 + $0x550] ss:$40 sps:$4 sm:$0xff]   ;;  %v5208_v9 = vld [vmem:[%s8075_s1 + $0x5a4] ss:$40 sps:$4 sm:$0xff]   ;;  %v5211_v11 = vld [vmem:[%s8075_s1 + $0x5a0] ss:$40 sps:$4 sm:$0xff]  }
   0x5   :  { %2997 = vmatprep.subr.bf16.mxu1 %v5202_v5  ;;  %v5212_v12 = vld [vmem:[%s8075_s1 + $0xf4] ss:$40 sps:$4 sm:$0xff]   ;;  %v5216_v14 = vld [vmem:[%s8075_s1 + $0xf0] ss:$40 sps:$4 sm:$0xff]   ;;  %v5218_v16 = vld [vmem:[%s8075_s1 + $0x144] ss:$40 sps:$4 sm:$0xff]  }
   0x6   :  { %v5214_v13 = vld [vmem:[%s8075_s1 + $0x5f4] ss:$40 sps:$4 sm:$0xff]   ;;  %v5217_v15 = vld [vmem:[%s8075_s1 + $0x5f0] ss:$40 sps:$4 sm:$0xff]   ;;  %v5220_v17 = vld [vmem:[%s8075_s1 + $0x644] ss:$40 sps:$4 sm:$0xff]  }
   0x7   :  { %2957 = vmatpush1.bf16.msra.mxu0 %v5204_v6  ;;  %v5222_v18 = vld [vmem:[%s8075_s1 + $0x140] ss:$40 sps:$4 sm:$0xff]   ;;  %v5224_v20 = vld [vmem:[%s8075_s1 + $0x194] ss:$40 sps:$4 sm:$0xff]   ;;  %v5228_v22 = vld [vmem:[%s8075_s1 + $0x190] ss:$40 sps:$4 sm:$0xff]  }
   0x8   :  { %2998 = vmatpush1.bf16.msra.mxu1 %v5205_v7  ;;  %2958 = vmatprep.subr.bf16.mxu0 %v5206_v8  ;;  %v5223_v19 = vld [vmem:[%s8075_s1 + $0x640] ss:$40 sps:$4 sm:$0xff]   ;;  %v5226_v21 = vld [vmem:[%s8075_s1 + $0x694] ss:$40 sps:$4 sm:$0xff]   ;;  %v5229_v23 = vld [vmem:[%s8075_s1 + $0x690] ss:$40 sps:$4 sm:$0xff]  }
   0x9   :  { %2999 = vmatprep.subr.bf16.mxu1 %v5208_v9  ;;  %v5230_v24 = vld [vmem:[%s8075_s1 + $0x1e4] ss:$40 sps:$4 sm:$0xff]   ;;  %v5234_v26 = vld [vmem:[%s8075_s1 + $0x1e0] ss:$40 sps:$4 sm:$0xff]   ;;  %v5236_v28 = vld [vmem:[%s8075_s1 + $0x234] ss:$40 sps:$4 sm:$0xff]  }
   0xa   :  { %v5232_v25 = vld [vmem:[%s8075_s1 + $0x6e4] ss:$40 sps:$4 sm:$0xff]   ;;  %v5235_v27 = vld [vmem:[%s8075_s1 + $0x6e0] ss:$40 sps:$4 sm:$0xff]   ;;  %v5238_v29 = vld [vmem:[%s8075_s1 + $0x734] ss:$40 sps:$4 sm:$0xff]  }
   0xb   :  { %2959 = vmatpush1.bf16.msra.mxu0 %v5210_v10  ;;  %v5240_v30 = vld [vmem:[%s8075_s1 + $0x230] ss:$40 sps:$4 sm:$0xff]   ;;  %v5242_v32 = vld [vmem:[%s8075_s1 + $0x284] ss:$40 sps:$4 sm:$0xff]   ;;  %v5246_v34 = vld [vmem:[%s8075_s1 + $0x280] ss:$40 sps:$4 sm:$0xff]  }
   0xc   :  { %3000 = vmatpush1.bf16.msra.mxu1 %v5211_v11  ;;  %2960 = vmatprep.subr.bf16.mxu0 %v5212_v12  ;;  %v5241_v31 = vld [vmem:[%s8075_s1 + $0x730] ss:$40 sps:$4 sm:$0xff]   ;;  %v5244_v33 = vld [vmem:[%s8075_s1 + $0x784] ss:$40 sps:$4 sm:$0xff]   ;;  %v5247_v35 = vld [vmem:[%s8075_s1 + $0x780] ss:$40 sps:$4 sm:$0xff]  }
   0xd   :  { %3001 = vmatprep.subr.bf16.mxu1 %v5214_v13  ;;  %v5248_v36 = vld [vmem:[%s8075_s1 + $0x2d4] ss:$40 sps:$4 sm:$0xff]   ;;  %v5252_v38 = vld [vmem:[%s8075_s1 + $0x2d0] ss:$40 sps:$4 sm:$0xff]   ;;  %v5254_v40 = vld [vmem:[%s8075_s1 + $0x324] ss:$40 sps:$4 sm:$0xff]  }
   0xe   :  { %v5250_v37 = vld [vmem:[%s8075_s1 + $0x7d4] ss:$40 sps:$4 sm:$0xff]   ;;  %v5253_v39 = vld [vmem:[%s8075_s1 + $0x7d0] ss:$40 sps:$4 sm:$0xff]   ;;  %v5256_v41 = vld [vmem:[%s8075_s1 + $0x824] ss:$40 sps:$4 sm:$0xff]  }
   0xf   :  { %2961 = vmatpush1.bf16.msra.mxu0 %v5216_v14  ;;  %v5258_v42 = vld [vmem:[%s8075_s1 + $0x320] ss:$40 sps:$4 sm:$0xff]   ;;  %v5260_v44 = vld [vmem:[%s8075_s1 + $0x374] ss:$40 sps:$4 sm:$0xff]   ;;  %v5264_v49 = vld [vmem:[%s8075_s1 + $0x370] ss:$40 sps:$4 sm:$0xff]  }
  0x10   :  { %3002 = vmatpush1.bf16.msra.mxu1 %v5217_v15  ;;  %2962 = vmatprep.subr.bf16.mxu0 %v5218_v16  ;;  %v5259_v43 = vld [vmem:[%s8075_s1 + $0x820] ss:$40 sps:$4 sm:$0xff]   ;;  %v5262_v45 = vld [vmem:[%s8075_s1 + $0x874] ss:$40 sps:$4 sm:$0xff]   ;;  %v5265_v50 = vld [vmem:[%s8075_s1 + $0x870] ss:$40 sps:$4 sm:$0xff]  }
  0x11   :  { %3003 = vmatprep.subr.bf16.mxu1 %v5220_v17  ;;  %v50_v46 = vld [vmem:[%s8076_s0] sm:$0xff]  ;;  %v51_v48 = vld [vmem:[%s8076_s0 + $0x8] sm:$0xff]  ;;  %v5272_v56 = vld [vmem:[%s8075_s1 + $0x414] ss:$40 sps:$4 sm:$0xff]  }
  0x12   :  { %v6104_v47 = vcombine.high %v50_v46, %v50_v46  ;;  %v6115_v51 = vcombine.high %v51_v48, %v51_v48  ;;  %v5266_v52 = vld [vmem:[%s8075_s1 + $0x3c4] ss:$40 sps:$4 sm:$0xff]   ;;  %v5270_v54 = vld [vmem:[%s8075_s1 + $0x3c0] ss:$40 sps:$4 sm:$0xff]   ;;  %v5274_v57 = vld [vmem:[%s8075_s1 + $0x914] ss:$40 sps:$4 sm:$0xff]   ;;  %v6173_v6 = vcombine.low %v50_v46, %v50_v46  ;;  %v6175_v7 = vcombine.low %v51_v48, %v51_v48 }
  0x13   :  { %2963 = vmatpush1.bf16.msra.mxu0 %v5222_v18  ;;  %v5268_v53 = vld [vmem:[%s8075_s1 + $0x8c4] ss:$40 sps:$4 sm:$0xff]   ;;  %v5271_v55 = vld [vmem:[%s8075_s1 + $0x8c0] ss:$40 sps:$4 sm:$0xff]   ;;  %v5276_v58 = vld [vmem:[%s8075_s1 + $0x410] ss:$40 sps:$4 sm:$0xff]  }
  0x14   :  { %3004 = vmatpush1.bf16.msra.mxu1 %v5223_v19  ;;  %2964 = vmatprep.subr.bf16.mxu0 %v5224_v20  ;;  %v5277_v59 = vld [vmem:[%s8075_s1 + $0x910] ss:$40 sps:$4 sm:$0xff]   ;;  %v5278_v60 = vld [vmem:[%s8075_s1 + $0x464] ss:$40 sps:$4 sm:$0xff]   ;;  %v5282_v62 = vld [vmem:[%s8075_s1 + $0x460] ss:$40 sps:$4 sm:$0xff]  }
  0x15   :  { %3005 = vmatprep.subr.bf16.mxu1 %v5226_v21  ;;  %2986 = vmatprep.mubr.bf16.mxu0 %v6104_v47  ;;  %v5280_v61 = vld [vmem:[%s8075_s1 + $0x964] ss:$40 sps:$4 sm:$0xff]   ;;  %v5283_v63 = vld [vmem:[%s8075_s1 + $0x960] ss:$40 sps:$4 sm:$0xff]   ;;  %v5284_v0 = vld [vmem:[%s8075_s1 + $0x4b4] ss:$40 sps:$4 sm:$0xff]  }
  0x16   :  { %3027 = vmatprep.mubr.bf16.mxu1 %v6115_v51  ;;  %v5286_v1 = vld [vmem:[%s8075_s1 + $0x9b4] ss:$40 sps:$4 sm:$0xff]   ;;  %v5288_v2 = vld [vmem:[%s8075_s1 + $0x4b0] ss:$40 sps:$4 sm:$0xff]   ;;  %v5296_v4 = vld [vmem:[%s8075_s1 + $0xa04] ss:$40 sps:$4 sm:$0xff]  }
  0x17   :  { %2965 = vmatpush1.bf16.msra.mxu0 %v5228_v22  ;;  %v5289_v3 = vld [vmem:[%s8075_s1 + $0x9b0] ss:$40 sps:$4 sm:$0xff]   ;;  %v5299_v5 = vld [vmem:[%s8075_s1 + $0xc] ss:$40 sps:$4 sm:$0xff]   ;;  %v5294_v8 = vld [vmem:[%s8075_s1 + $0xa00] ss:$40 sps:$4 sm:$0xff]  }
  0x18   :  { %3006 = vmatpush1.bf16.msra.mxu1 %v5229_v23  ;;  %2966 = vmatprep.subr.bf16.mxu0 %v5230_v24  ;;  %v5297_v9 = vld [vmem:[%s8075_s1 + $0x8] ss:$40 sps:$4 sm:$0xff]   ;;  %v5302_v10 = vld [vmem:[%s8075_s1 + $0xa54] ss:$40 sps:$4 sm:$0xff]   ;;  %v5303_v13 = vld [vmem:[%s8075_s1 + $0x58] ss:$40 sps:$4 sm:$0xff]  }
  0x19   :  { %3007 = vmatprep.subr.bf16.mxu1 %v5232_v25  ;;  %v5305_v11 = vld [vmem:[%s8075_s1 + $0x5c] ss:$40 sps:$4 sm:$0xff]   ;;  %v5300_v12 = vld [vmem:[%s8075_s1 + $0xa50] ss:$40 sps:$4 sm:$0xff]   ;;  %v5311_v15 = vld [vmem:[%s8075_s1 + $0xac] ss:$40 sps:$4 sm:$0xff]  }
  0x1a   :  { %v5308_v14 = vld [vmem:[%s8075_s1 + $0xaa4] ss:$40 sps:$4 sm:$0xff]   ;;  %v5306_v16 = vld [vmem:[%s8075_s1 + $0xaa0] ss:$40 sps:$4 sm:$0xff]   ;;  %v5314_v18 = vld [vmem:[%s8075_s1 + $0xaf4] ss:$40 sps:$4 sm:$0xff]  }
  0x1b   :  { %2967 = vmatpush1.bf16.msra.mxu0 %v5234_v26  ;;  %v5309_v17 = vld [vmem:[%s8075_s1 + $0xa8] ss:$40 sps:$4 sm:$0xff]   ;;  %v5317_v19 = vld [vmem:[%s8075_s1 + $0xfc] ss:$40 sps:$4 sm:$0xff]   ;;  %v5315_v21 = vld [vmem:[%s8075_s1 + $0xf8] ss:$40 sps:$4 sm:$0xff]  }
  0x1c   :  { %3008 = vmatpush1.bf16.msra.mxu1 %v5235_v27  ;;  %2968 = vmatprep.subr.bf16.mxu0 %v5236_v28  ;;  %v5312_v20 = vld [vmem:[%s8075_s1 + $0xaf0] ss:$40 sps:$4 sm:$0xff]   ;;  %v5320_v22 = vld [vmem:[%s8075_s1 + $0xb44] ss:$40 sps:$4 sm:$0xff]   ;;  %v5318_v24 = vld [vmem:[%s8075_s1 + $0xb40] ss:$40 sps:$4 sm:$0xff]  }
  0x1d   :  { %3009 = vmatprep.subr.bf16.mxu1 %v5238_v29  ;;  %v5323_v23 = vld [vmem:[%s8075_s1 + $0x14c] ss:$40 sps:$4 sm:$0xff]   ;;  %v5321_v25 = vld [vmem:[%s8075_s1 + $0x148] ss:$40 sps:$4 sm:$0xff]   ;;  %v5329_v27 = vld [vmem:[%s8075_s1 + $0x19c] ss:$40 sps:$4 sm:$0xff]  }
  0x1e   :  { %v5326_v26 = vld [vmem:[%s8075_s1 + $0xb94] ss:$40 sps:$4 sm:$0xff]   ;;  %v5324_v28 = vld [vmem:[%s8075_s1 + $0xb90] ss:$40 sps:$4 sm:$0xff]  }
  0x1f   :  { %2969 = vmatpush1.bf16.msra.mxu0 %v5240_v30  ;;  %v5327_v29 = vld [vmem:[%s8075_s1 + $0x198] ss:$40 sps:$4 sm:$0xff]   ;;  %v5332_v30 = vld [vmem:[%s8075_s1 + $0xbe4] ss:$40 sps:$4 sm:$0xff]  }
  0x20   :  { %3010 = vmatpush1.bf16.msra.mxu1 %v5241_v31  ;;  %2970 = vmatprep.subr.bf16.mxu0 %v5242_v32  ;;  %v5335_v31 = vld [vmem:[%s8075_s1 + $0x1ec] ss:$40 sps:$4 sm:$0xff]   ;;  %v5348_v46 = vld [vmem:[%s8075_s1 + $0xcd0] ss:$40 sps:$4 sm:$0xff]  }
  0x21   :  { %3011 = vmatprep.subr.bf16.mxu1 %v5244_v33  ;;  %v6255_v32 = vld [vmem:[%s8076_s0 + $0x10] sm:$0xff]  ;;  %v5330_v33 = vld [vmem:[%s8075_s1 + $0xbe0] ss:$40 sps:$4 sm:$0xff]  }
  0x22   :  { %v5351_v48 = vld [vmem:[%s8075_s1 + $0x2d8] ss:$40 sps:$4 sm:$0xff]  }
  0x23   :  { %2971 = vmatpush1.bf16.msra.mxu0 %v5246_v34  ;;  %v6262_v34 = vcombine.high %v6255_v32, %v6255_v32 }
  0x24   :  { %3012 = vmatpush1.bf16.msra.mxu1 %v5247_v35  ;;  %2972 = vmatprep.subr.bf16.mxu0 %v5248_v36  ;;  %v5333_v35 = vld [vmem:[%s8075_s1 + $0x1e8] ss:$40 sps:$4 sm:$0xff]   ;;  %v5338_v36 = vld [vmem:[%s8075_s1 + $0xc34] ss:$40 sps:$4 sm:$0xff]  }
  0x25   :  { %3013 = vmatprep.subr.bf16.mxu1 %v5250_v37  ;;  %v5341_v37 = vld [vmem:[%s8075_s1 + $0x23c] ss:$40 sps:$4 sm:$0xff]  }
  0x27   :  { %2973 = vmatpush1.bf16.msra.mxu0 %v5252_v38  ;;  %v5336_v38 = vld [vmem:[%s8075_s1 + $0xc30] ss:$40 sps:$4 sm:$0xff]  }
  0x28   :  { %3014 = vmatpush1.bf16.msra.mxu1 %v5253_v39  ;;  %2974 = vmatprep.subr.bf16.mxu0 %v5254_v40  ;;  %v5339_v39 = vld [vmem:[%s8075_s1 + $0x238] ss:$40 sps:$4 sm:$0xff]   ;;  %v5344_v40 = vld [vmem:[%s8075_s1 + $0xc84] ss:$40 sps:$4 sm:$0xff]  }
  0x29   :  { %3015 = vmatprep.subr.bf16.mxu1 %v5256_v41  ;;  %v5347_v41 = vld [vmem:[%s8075_s1 + $0x28c] ss:$40 sps:$4 sm:$0xff]  }
  0x2b   :  { %2975 = vmatpush1.bf16.msra.mxu0 %v5258_v42  ;;  %v5342_v42 = vld [vmem:[%s8075_s1 + $0xc80] ss:$40 sps:$4 sm:$0xff]  }
  0x2c   :  { %3016 = vmatpush1.bf16.msra.mxu1 %v5259_v43  ;;  %2976 = vmatprep.subr.bf16.mxu0 %v5260_v44  ;;  %v5345_v43 = vld [vmem:[%s8075_s1 + $0x288] ss:$40 sps:$4 sm:$0xff]   ;;  %v5350_v44 = vld [vmem:[%s8075_s1 + $0xcd4] ss:$40 sps:$4 sm:$0xff]  }
  0x2d   :  { %3017 = vmatprep.subr.bf16.mxu1 %v5262_v45  ;;  %v5353_v45 = vld [vmem:[%s8075_s1 + $0x2dc] ss:$40 sps:$4 sm:$0xff]  }
  0x2f   :  { %2977 = vmatpush1.bf16.msra.mxu0 %v5264_v49  ;;  %v5356_v49 = vld [vmem:[%s8075_s1 + $0xd24] ss:$40 sps:$4 sm:$0xff]  }
  0x30   :  { %3018 = vmatpush1.bf16.msra.mxu1 %v5265_v50  ;;  %2978 = vmatprep.subr.bf16.mxu0 %v5266_v52  ;;  %v5359_v50 = vld [vmem:[%s8075_s1 + $0x32c] ss:$40 sps:$4 sm:$0xff]   ;;  %v5354_v52 = vld [vmem:[%s8075_s1 + $0xd20] ss:$40 sps:$4 sm:$0xff]  }
  0x31   :  { %3019 = vmatprep.subr.bf16.mxu1 %v5268_v53  ;;  %v5357_v53 = vld [vmem:[%s8075_s1 + $0x328] ss:$40 sps:$4 sm:$0xff]  }
  0x33   :  { %2979 = vmatpush1.bf16.msra.mxu0 %v5270_v54  ;;  %v5362_v54 = vld [vmem:[%s8075_s1 + $0xd74] ss:$40 sps:$4 sm:$0xff]  }
  0x34   :  { %3020 = vmatpush1.bf16.msra.mxu1 %v5271_v55  ;;  %2980 = vmatprep.subr.bf16.mxu0 %v5272_v56  ;;  %v5365_v55 = vld [vmem:[%s8075_s1 + $0x37c] ss:$40 sps:$4 sm:$0xff]   ;;  %v5360_v56 = vld [vmem:[%s8075_s1 + $0xd70] ss:$40 sps:$4 sm:$0xff]  }
  0x35   :  { %3021 = vmatprep.subr.bf16.mxu1 %v5274_v57  ;;  %v5363_v57 = vld [vmem:[%s8075_s1 + $0x378] ss:$40 sps:$4 sm:$0xff]  }
  0x37   :  { %2981 = vmatpush1.bf16.msra.mxu0 %v5276_v58  ;;  %v5368_v58 = vld [vmem:[%s8075_s1 + $0xdc4] ss:$40 sps:$4 sm:$0xff]  }
  0x38   :  { %3022 = vmatpush1.bf16.msra.mxu1 %v5277_v59  ;;  %2982 = vmatprep.subr.bf16.mxu0 %v5278_v60  ;;  %v5371_v59 = vld [vmem:[%s8075_s1 + $0x3cc] ss:$40 sps:$4 sm:$0xff]   ;;  %v5366_v60 = vld [vmem:[%s8075_s1 + $0xdc0] ss:$40 sps:$4 sm:$0xff]  }
  0x39   :  { %3023 = vmatprep.subr.bf16.mxu1 %v5280_v61  ;;  %v5369_v61 = vld [vmem:[%s8075_s1 + $0x3c8] ss:$40 sps:$4 sm:$0xff]  }
  0x3b   :  { %2983 = vmatpush1.bf16.msra.mxu0 %v5282_v62  ;;  %v5374_v62 = vld [vmem:[%s8075_s1 + $0xe14] ss:$40 sps:$4 sm:$0xff]  }
  0x3c   :  { %3024 = vmatpush1.bf16.msra.mxu1 %v5283_v63  ;;  %2984 = vmatprep.subr.bf16.mxu0 %v5284_v0  ;;  %v5377_v63 = vld [vmem:[%s8075_s1 + $0x41c] ss:$40 sps:$4 sm:$0xff]   ;;  %v5372_v0 = vld [vmem:[%s8075_s1 + $0xe10] ss:$40 sps:$4 sm:$0xff]  }
  0x3d   :  { %3025 = vmatprep.subr.bf16.mxu1 %v5286_v1  ;;  %v5375_v1 = vld [vmem:[%s8075_s1 + $0x418] ss:$40 sps:$4 sm:$0xff]  }
  0x3f   :  { %2985 = vmatpush1.bf16.msra.mxu0 %v5288_v2  ;;  %v5380_v2 = vld [vmem:[%s8075_s1 + $0xe64] ss:$40 sps:$4 sm:$0xff]  }
  0x40   :  { %3026 = vmatpush1.bf16.msra.mxu1 %v5289_v3  ;;  %3036 = vmatprep.subr.bf16.mxu0 %v5296_v4  ;;  %v5383_v3 = vld [vmem:[%s8075_s1 + $0x46c] ss:$40 sps:$4 sm:$0xff]   ;;  %v5378_v4 = vld [vmem:[%s8075_s1 + $0xe60] ss:$40 sps:$4 sm:$0xff]  }
  0x41   :  { %3077 = vmatprep.subr.bf16.mxu1 %v5299_v5  ;;  %v5381_v5 = vld [vmem:[%s8075_s1 + $0x468] ss:$40 sps:$4 sm:$0xff]  }
  0x42   :  { %2987 = vmatmul.mubr.bf16.vlgmr.msra.gmra.mrb[0].mxu0 %v6173_v6 }
  0x43   :  { %3028 = vmatmul.mubr.bf16.vlgmr.msra.gmra.mrb[0].mxu1 %v6175_v7  ;;  %3037 = vmatpush1.bf16.msra.mxu0 %v5294_v8  ;;  %v5386_v8 = vld [vmem:[%s8075_s1 + $0xeb4] ss:$40 sps:$4 sm:$0xff]  }
  0x44   :  { %3078 = vmatpush1.bf16.msra.mxu1 %v5297_v9  ;;  %3038 = vmatprep.subr.bf16.mxu0 %v5302_v10  ;;  %v5389_v9 = vld [vmem:[%s8075_s1 + $0x4bc] ss:$40 sps:$4 sm:$0xff]   ;;  %v5384_v10 = vld [vmem:[%s8075_s1 + $0xeb0] ss:$40 sps:$4 sm:$0xff]  }
  0x45   :  { %3079 = vmatprep.subr.bf16.mxu1 %v5305_v11  ;;  %3109 = vmatprep.mubr.bf16.mxu1 %v6104_v47  ;;  %v5387_v11 = vld [vmem:[%s8075_s1 + $0x4b8] ss:$40 sps:$4 sm:$0xff]  }
  0x46   :  { %3068 = vmatprep.mubr.bf16.mxu0 %v6262_v34 }
  0x47   :  { %3039 = vmatpush1.bf16.msra.mxu0 %v5300_v12  ;;  %v5394_v12 = vld [vmem:[%s8075_s1 + $0x50c] ss:$40 sps:$4 sm:$0xff]  }
  0x48   :  { %3080 = vmatpush1.bf16.msra.mxu1 %v5303_v13  ;;  %3040 = vmatprep.subr.bf16.mxu0 %v5308_v14  ;;  %v5397_v13 = vld [vmem:[%s8075_s1 + $0xa0c] ss:$40 sps:$4 sm:$0xff]   ;;  %v6384_v14 = vcombine.low %v6255_v32, %v6255_v32  ;;  %v5419_v32 = vld [vmem:[%s8075_s1 + $0xb48] ss:$40 sps:$4 sm:$0xff]  }
  0x49   :  { %3081 = vmatprep.subr.bf16.mxu1 %v5311_v15  ;;  %v5392_v15 = vld [vmem:[%s8075_s1 + $0x508] ss:$40 sps:$4 sm:$0xff]  }
  0x4b   :  { %3041 = vmatpush1.bf16.msra.mxu0 %v5306_v16  ;;  %v5395_v16 = vld [vmem:[%s8075_s1 + $0xa08] ss:$40 sps:$4 sm:$0xff]  }
  0x4c   :  { %3082 = vmatpush1.bf16.msra.mxu1 %v5309_v17  ;;  %3042 = vmatprep.subr.bf16.mxu0 %v5314_v18  ;;  %v5400_v17 = vld [vmem:[%s8075_s1 + $0x55c] ss:$40 sps:$4 sm:$0xff]  }
  0x4d   :  { %3083 = vmatprep.subr.bf16.mxu1 %v5317_v19  ;;  %v5403_v18 = vld [vmem:[%s8075_s1 + $0xa5c] ss:$40 sps:$4 sm:$0xff]   ;;  %v5398_v19 = vld [vmem:[%s8075_s1 + $0x558] ss:$40 sps:$4 sm:$0xff]  }
  0x4f   :  { %3043 = vmatpush1.bf16.msra.mxu0 %v5312_v20  ;;  %v5401_v20 = vld [vmem:[%s8075_s1 + $0xa58] ss:$40 sps:$4 sm:$0xff]  }
  0x50   :  { %3084 = vmatpush1.bf16.msra.mxu1 %v5315_v21  ;;  %3044 = vmatprep.subr.bf16.mxu0 %v5320_v22  ;;  %v5406_v21 = vld [vmem:[%s8075_s1 + $0x5ac] ss:$40 sps:$4 sm:$0xff]  }
  0x51   :  { %3085 = vmatprep.subr.bf16.mxu1 %v5323_v23  ;;  %v5409_v22 = vld [vmem:[%s8075_s1 + $0xaac] ss:$40 sps:$4 sm:$0xff]   ;;  %v5404_v23 = vld [vmem:[%s8075_s1 + $0x5a8] ss:$40 sps:$4 sm:$0xff]  }
  0x53   :  { %3045 = vmatpush1.bf16.msra.mxu0 %v5318_v24  ;;  %v5407_v24 = vld [vmem:[%s8075_s1 + $0xaa8] ss:$40 sps:$4 sm:$0xff]  }
  0x54   :  { %3086 = vmatpush1.bf16.msra.mxu1 %v5321_v25  ;;  %3046 = vmatprep.subr.bf16.mxu0 %v5326_v26  ;;  %v5412_v25 = vld [vmem:[%s8075_s1 + $0x5fc] ss:$40 sps:$4 sm:$0xff]  }
  0x55   :  { %3087 = vmatprep.subr.bf16.mxu1 %v5329_v27  ;;  %v5415_v26 = vld [vmem:[%s8075_s1 + $0xafc] ss:$40 sps:$4 sm:$0xff]   ;;  %v5410_v27 = vld [vmem:[%s8075_s1 + $0x5f8] ss:$40 sps:$4 sm:$0xff]  }
  0x57   :  { %3047 = vmatpush1.bf16.msra.mxu0 %v5324_v28  ;;  %v5413_v28 = vld [vmem:[%s8075_s1 + $0xaf8] ss:$40 sps:$4 sm:$0xff]  }
  0x58   :  { %3088 = vmatpush1.bf16.msra.mxu1 %v5327_v29  ;;  %3048 = vmatprep.subr.bf16.mxu0 %v5332_v30  ;;  %v5418_v29 = vld [vmem:[%s8075_s1 + $0x64c] ss:$40 sps:$4 sm:$0xff]  }
  0x59   :  { %3089 = vmatprep.subr.bf16.mxu1 %v5335_v31  ;;  %v5421_v30 = vld [vmem:[%s8075_s1 + $0xb4c] ss:$40 sps:$4 sm:$0xff]   ;;  %v5416_v31 = vld [vmem:[%s8075_s1 + $0x648] ss:$40 sps:$4 sm:$0xff]  }
  0x5b   :  { %3049 = vmatpush1.bf16.msra.mxu0 %v5330_v33  ;;  %v5424_v33 = vld [vmem:[%s8075_s1 + $0x69c] ss:$40 sps:$4 sm:$0xff]  }
  0x5c   :  { %3090 = vmatpush1.bf16.msra.mxu1 %v5333_v35  ;;  %3050 = vmatprep.subr.bf16.mxu0 %v5338_v36  ;;  %v5427_v35 = vld [vmem:[%s8075_s1 + $0xb9c] ss:$40 sps:$4 sm:$0xff]   ;;  %v5422_v36 = vld [vmem:[%s8075_s1 + $0x698] ss:$40 sps:$4 sm:$0xff]  }
  0x5d   :  { %3091 = vmatprep.subr.bf16.mxu1 %v5341_v37  ;;  %v5425_v37 = vld [vmem:[%s8075_s1 + $0xb98] ss:$40 sps:$4 sm:$0xff]  }
  0x5f   :  { %3051 = vmatpush1.bf16.msra.mxu0 %v5336_v38  ;;  %v5430_v38 = vld [vmem:[%s8075_s1 + $0x6ec] ss:$40 sps:$4 sm:$0xff]  }
  0x60   :  { %3092 = vmatpush1.bf16.msra.mxu1 %v5339_v39  ;;  %3052 = vmatprep.subr.bf16.mxu0 %v5344_v40  ;;  %v5433_v39 = vld [vmem:[%s8075_s1 + $0xbec] ss:$40 sps:$4 sm:$0xff]   ;;  %v5428_v40 = vld [vmem:[%s8075_s1 + $0x6e8] ss:$40 sps:$4 sm:$0xff]  }
  0x61   :  { %3093 = vmatprep.subr.bf16.mxu1 %v5347_v41  ;;  %v5431_v41 = vld [vmem:[%s8075_s1 + $0xbe8] ss:$40 sps:$4 sm:$0xff]  }
  0x63   :  { %3053 = vmatpush1.bf16.msra.mxu0 %v5342_v42  ;;  %v5436_v42 = vld [vmem:[%s8075_s1 + $0x73c] ss:$40 sps:$4 sm:$0xff]  }
  0x64   :  { %3094 = vmatpush1.bf16.msra.mxu1 %v5345_v43  ;;  %3054 = vmatprep.subr.bf16.mxu0 %v5350_v44  ;;  %v5439_v43 = vld [vmem:[%s8075_s1 + $0xc3c] ss:$40 sps:$4 sm:$0xff]   ;;  %v5434_v44 = vld [vmem:[%s8075_s1 + $0x738] ss:$40 sps:$4 sm:$0xff]  }
  0x65   :  { %3095 = vmatprep.subr.bf16.mxu1 %v5353_v45  ;;  %v5437_v45 = vld [vmem:[%s8075_s1 + $0xc38] ss:$40 sps:$4 sm:$0xff]  }
  0x67   :  { %3055 = vmatpush1.bf16.msra.mxu0 %v5348_v46  ;;  %v5442_v46 = vld [vmem:[%s8075_s1 + $0x78c] ss:$40 sps:$4 sm:$0xff]  }
  0x68   :  { %3096 = vmatpush1.bf16.msra.mxu1 %v5351_v48  ;;  %3056 = vmatprep.subr.bf16.mxu0 %v5356_v49  ;;  %v5445_v48 = vld [vmem:[%s8075_s1 + $0xc8c] ss:$40 sps:$4 sm:$0xff]   ;;  %v5440_v49 = vld [vmem:[%s8075_s1 + $0x788] ss:$40 sps:$4 sm:$0xff]  }
  0x69   :  { %3097 = vmatprep.subr.bf16.mxu1 %v5359_v50  ;;  %v5443_v50 = vld [vmem:[%s8075_s1 + $0xc88] ss:$40 sps:$4 sm:$0xff]  }
  0x6b   :  { %3057 = vmatpush1.bf16.msra.mxu0 %v5354_v52  ;;  %v5448_v52 = vld [vmem:[%s8075_s1 + $0x7dc] ss:$40 sps:$4 sm:$0xff]  }
  0x6c   :  { %3098 = vmatpush1.bf16.msra.mxu1 %v5357_v53  ;;  %3058 = vmatprep.subr.bf16.mxu0 %v5362_v54  ;;  %v5451_v53 = vld [vmem:[%s8075_s1 + $0xcdc] ss:$40 sps:$4 sm:$0xff]   ;;  %v5446_v54 = vld [vmem:[%s8075_s1 + $0x7d8] ss:$40 sps:$4 sm:$0xff]  }
  0x6d   :  { %3099 = vmatprep.subr.bf16.mxu1 %v5365_v55  ;;  %v5449_v55 = vld [vmem:[%s8075_s1 + $0xcd8] ss:$40 sps:$4 sm:$0xff]  }
  0x6f   :  { %3059 = vmatpush1.bf16.msra.mxu0 %v5360_v56  ;;  %v5454_v56 = vld [vmem:[%s8075_s1 + $0x82c] ss:$40 sps:$4 sm:$0xff]  }
  0x70   :  { %3100 = vmatpush1.bf16.msra.mxu1 %v5363_v57  ;;  %3060 = vmatprep.subr.bf16.mxu0 %v5368_v58  ;;  %v5457_v57 = vld [vmem:[%s8075_s1 + $0xd2c] ss:$40 sps:$4 sm:$0xff]   ;;  %v5452_v58 = vld [vmem:[%s8075_s1 + $0x828] ss:$40 sps:$4 sm:$0xff]  }
  0x71   :  { %3101 = vmatprep.subr.bf16.mxu1 %v5371_v59  ;;  %v5455_v59 = vld [vmem:[%s8075_s1 + $0xd28] ss:$40 sps:$4 sm:$0xff]  }
  0x73   :  { %3061 = vmatpush1.bf16.msra.mxu0 %v5366_v60  ;;  %v5460_v60 = vld [vmem:[%s8075_s1 + $0x87c] ss:$40 sps:$4 sm:$0xff]  }
  0x74   :  { %3102 = vmatpush1.bf16.msra.mxu1 %v5369_v61  ;;  %3062 = vmatprep.subr.bf16.mxu0 %v5374_v62  ;;  %v5463_v61 = vld [vmem:[%s8075_s1 + $0xd7c] ss:$40 sps:$4 sm:$0xff]   ;;  %v5458_v62 = vld [vmem:[%s8075_s1 + $0x878] ss:$40 sps:$4 sm:$0xff]  }
  0x75   :  { %3103 = vmatprep.subr.bf16.mxu1 %v5377_v63  ;;  %v5461_v63 = vld [vmem:[%s8075_s1 + $0xd78] ss:$40 sps:$4 sm:$0xff]  }
  0x77   :  { %3063 = vmatpush1.bf16.msra.mxu0 %v5372_v0  ;;  %v5466_v0 = vld [vmem:[%s8075_s1 + $0x8cc] ss:$40 sps:$4 sm:$0xff]  }
  0x78   :  { %3104 = vmatpush1.bf16.msra.mxu1 %v5375_v1  ;;  %3064 = vmatprep.subr.bf16.mxu0 %v5380_v2  ;;  %v5469_v1 = vld [vmem:[%s8075_s1 + $0xdcc] ss:$40 sps:$4 sm:$0xff]   ;;  %v5464_v2 = vld [vmem:[%s8075_s1 + $0x8c8] ss:$40 sps:$4 sm:$0xff]  }
  0x79   :  { %3105 = vmatprep.subr.bf16.mxu1 %v5383_v3  ;;  %v5467_v3 = vld [vmem:[%s8075_s1 + $0xdc8] ss:$40 sps:$4 sm:$0xff]  }
  0x7b   :  { %3065 = vmatpush1.bf16.msra.mxu0 %v5378_v4  ;;  %v5472_v4 = vld [vmem:[%s8075_s1 + $0x91c] ss:$40 sps:$4 sm:$0xff]  }
  0x7c   :  { %3106 = vmatpush1.bf16.msra.mxu1 %v5381_v5  ;;  %3066 = vmatprep.subr.bf16.mxu0 %v5386_v8  ;;  %v5475_v5 = vld [vmem:[%s8075_s1 + $0xe1c] ss:$40 sps:$4 sm:$0xff]   ;;  %v5470_v8 = vld [vmem:[%s8075_s1 + $0x918] ss:$40 sps:$4 sm:$0xff]  }
  0x7d   :  { %3107 = vmatprep.subr.bf16.mxu1 %v5389_v9  ;;  %v5473_v9 = vld [vmem:[%s8075_s1 + $0xe18] ss:$40 sps:$4 sm:$0xff]  }
  0x7f   :  { %3067 = vmatpush1.bf16.msra.mxu0 %v5384_v10  ;;  %v5478_v10 = vld [vmem:[%s8075_s1 + $0x96c] ss:$40 sps:$4 sm:$0xff]  }
  0x80   :  { %3108 = vmatpush1.bf16.msra.mxu1 %v5387_v11  ;;  %3118 = vmatprep.subr.bf16.mxu0 %v5394_v12  ;;  %v5481_v11 = vld [vmem:[%s8075_s1 + $0xe6c] ss:$40 sps:$4 sm:$0xff]   ;;  %v5476_v12 = vld [vmem:[%s8075_s1 + $0x968] ss:$40 sps:$4 sm:$0xff]  }
  0x81   :  { %3159 = vmatprep.subr.bf16.mxu1 %v5397_v13  ;;  %v5479_v13 = vld [vmem:[%s8075_s1 + $0xe68] ss:$40 sps:$4 sm:$0xff]  }
  0x82   :  { %3069 = vmatmul.mubr.bf16.vlgmr.msra.gmra.mrb[4].mxu0 %v6384_v14 }
  0x83   :  { %3110 = vmatmul.mubr.bf16.vlgmr.msra.gmra.mrb[4].mxu1 %v6173_v6  ;;  %3119 = vmatpush1.bf16.msra.mxu0 %v5392_v15  ;;  %v5484_v15 = vld [vmem:[%s8075_s1 + $0x9bc] ss:$40 sps:$4 sm:$0xff]  }
  0x84   :  { %3160 = vmatpush1.bf16.msra.mxu1 %v5395_v16  ;;  %3120 = vmatprep.subr.bf16.mxu0 %v5400_v17  ;;  %v5487_v16 = vld [vmem:[%s8075_s1 + $0xebc] ss:$40 sps:$4 sm:$0xff]   ;;  %v5482_v17 = vld [vmem:[%s8075_s1 + $0x9b8] ss:$40 sps:$4 sm:$0xff]  }
  0x85   :  { %3161 = vmatprep.subr.bf16.mxu1 %v5403_v18  ;;  %3150 = vmatprep.mubr.bf16.mxu0 %v6115_v51  ;;  %v5485_v18 = vld [vmem:[%s8075_s1 + $0xeb8] ss:$40 sps:$4 sm:$0xff]  }
  0x86   :  { %3191 = vmatprep.mubr.bf16.mxu1 %v6262_v34 }
  0x87   :  { %3121 = vmatpush1.bf16.msra.mxu0 %v5398_v19  ;;  %v5490_v19 = vld [vmem:[%s8075_s1 + $0x14] ss:$40 sps:$4 sm:$0xff]  }
  0x88   :  { %3162 = vmatpush1.bf16.msra.mxu1 %v5401_v20  ;;  %3122 = vmatprep.subr.bf16.mxu0 %v5406_v21  ;;  %v5493_v20 = vld [vmem:[%s8075_s1 + $0x514] ss:$40 sps:$4 sm:$0xff]   ;;  %v5488_v21 = vld [vmem:[%s8075_s1 + $0x10] ss:$40 sps:$4 sm:$0xff]  }
  0x89   :  { %3163 = vmatprep.subr.bf16.mxu1 %v5409_v22  ;;  %v5491_v22 = vld [vmem:[%s8075_s1 + $0x510] ss:$40 sps:$4 sm:$0xff]  }
  0x8b   :  { %3123 = vmatpush1.bf16.msra.mxu0 %v5404_v23  ;;  %v5496_v23 = vld [vmem:[%s8075_s1 + $0x64] ss:$40 sps:$4 sm:$0xff]  }
  0x8c   :  { %3164 = vmatpush1.bf16.msra.mxu1 %v5407_v24  ;;  %3124 = vmatprep.subr.bf16.mxu0 %v5412_v25  ;;  %v5499_v24 = vld [vmem:[%s8075_s1 + $0x564] ss:$40 sps:$4 sm:$0xff]   ;;  %v5494_v25 = vld [vmem:[%s8075_s1 + $0x60] ss:$40 sps:$4 sm:$0xff]  }
  0x8d   :  { %3165 = vmatprep.subr.bf16.mxu1 %v5415_v26  ;;  %v5497_v26 = vld [vmem:[%s8075_s1 + $0x560] ss:$40 sps:$4 sm:$0xff]  }
  0x8f   :  { %3125 = vmatpush1.bf16.msra.mxu0 %v5410_v27  ;;  %v5502_v27 = vld [vmem:[%s8075_s1 + $0xb4] ss:$40 sps:$4 sm:$0xff]  }
  0x90   :  { %3166 = vmatpush1.bf16.msra.mxu1 %v5413_v28  ;;  %3126 = vmatprep.subr.bf16.mxu0 %v5418_v29  ;;  %v5505_v28 = vld [vmem:[%s8075_s1 + $0x5b4] ss:$40 sps:$4 sm:$0xff]   ;;  %v5500_v29 = vld [vmem:[%s8075_s1 + $0xb0] ss:$40 sps:$4 sm:$0xff]  }
  0x91   :  { %3167 = vmatprep.subr.bf16.mxu1 %v5421_v30  ;;  %v5503_v30 = vld [vmem:[%s8075_s1 + $0x5b0] ss:$40 sps:$4 sm:$0xff]  }
  0x93   :  { %3127 = vmatpush1.bf16.msra.mxu0 %v5416_v31  ;;  %v5508_v31 = vld [vmem:[%s8075_s1 + $0x104] ss:$40 sps:$4 sm:$0xff]  }
  0x94   :  { %3168 = vmatpush1.bf16.msra.mxu1 %v5419_v32  ;;  %3128 = vmatprep.subr.bf16.mxu0 %v5424_v33  ;;  %v5511_v32 = vld [vmem:[%s8075_s1 + $0x604] ss:$40 sps:$4 sm:$0xff]   ;;  %v5506_v33 = vld [vmem:[%s8075_s1 + $0x100] ss:$40 sps:$4 sm:$0xff]  }
  0x95   :  { %3169 = vmatprep.subr.bf16.mxu1 %v5427_v35  ;;  %v5509_v35 = vld [vmem:[%s8075_s1 + $0x600] ss:$40 sps:$4 sm:$0xff]  }
  0x97   :  { %3129 = vmatpush1.bf16.msra.mxu0 %v5422_v36  ;;  %v5514_v36 = vld [vmem:[%s8075_s1 + $0x154] ss:$40 sps:$4 sm:$0xff]  }
  0x98   :  { %3170 = vmatpush1.bf16.msra.mxu1 %v5425_v37  ;;  %3130 = vmatprep.subr.bf16.mxu0 %v5430_v38  ;;  %v5517_v37 = vld [vmem:[%s8075_s1 + $0x654] ss:$40 sps:$4 sm:$0xff]   ;;  %v5512_v38 = vld [vmem:[%s8075_s1 + $0x150] ss:$40 sps:$4 sm:$0xff]  }
  0x99   :  { %3171 = vmatprep.subr.bf16.mxu1 %v5433_v39  ;;  %v5515_v39 = vld [vmem:[%s8075_s1 + $0x650] ss:$40 sps:$4 sm:$0xff]  }
  0x9b   :  { %3131 = vmatpush1.bf16.msra.mxu0 %v5428_v40  ;;  %v5520_v40 = vld [vmem:[%s8075_s1 + $0x1a4] ss:$40 sps:$4 sm:$0xff]  }
  0x9c   :  { %3172 = vmatpush1.bf16.msra.mxu1 %v5431_v41  ;;  %3132 = vmatprep.subr.bf16.mxu0 %v5436_v42  ;;  %v5523_v41 = vld [vmem:[%s8075_s1 + $0x6a4] ss:$40 sps:$4 sm:$0xff]   ;;  %v5518_v42 = vld [vmem:[%s8075_s1 + $0x1a0] ss:$40 sps:$4 sm:$0xff]  }
  0x9d   :  { %3173 = vmatprep.subr.bf16.mxu1 %v5439_v43  ;;  %v5521_v43 = vld [vmem:[%s8075_s1 + $0x6a0] ss:$40 sps:$4 sm:$0xff]  }
  0x9f   :  { %3133 = vmatpush1.bf16.msra.mxu0 %v5434_v44  ;;  %v5526_v44 = vld [vmem:[%s8075_s1 + $0x1f4] ss:$40 sps:$4 sm:$0xff]  }
  0xa0   :  { %3174 = vmatpush1.bf16.msra.mxu1 %v5437_v45  ;;  %3134 = vmatprep.subr.bf16.mxu0 %v5442_v46  ;;  %v5529_v45 = vld [vmem:[%s8075_s1 + $0x6f4] ss:$40 sps:$4 sm:$0xff]   ;;  %v5524_v46 = vld [vmem:[%s8075_s1 + $0x1f0] ss:$40 sps:$4 sm:$0xff]  }
  0xa1   :  { %3175 = vmatprep.subr.bf16.mxu1 %v5445_v48  ;;  %v5527_v48 = vld [vmem:[%s8075_s1 + $0x6f0] ss:$40 sps:$4 sm:$0xff]  }
  0xa3   :  { %3135 = vmatpush1.bf16.msra.mxu0 %v5440_v49  ;;  %v5532_v49 = vld [vmem:[%s8075_s1 + $0x244] ss:$40 sps:$4 sm:$0xff]  }
  0xa4   :  { %3176 = vmatpush1.bf16.msra.mxu1 %v5443_v50  ;;  %3136 = vmatprep.subr.bf16.mxu0 %v5448_v52  ;;  %v5535_v50 = vld [vmem:[%s8075_s1 + $0x744] ss:$40 sps:$4 sm:$0xff]   ;;  %v5530_v52 = vld [vmem:[%s8075_s1 + $0x240] ss:$40 sps:$4 sm:$0xff]  }
  0xa5   :  { %3177 = vmatprep.subr.bf16.mxu1 %v5451_v53  ;;  %v5533_v53 = vld [vmem:[%s8075_s1 + $0x740] ss:$40 sps:$4 sm:$0xff]  }
  0xa7   :  { %3137 = vmatpush1.bf16.msra.mxu0 %v5446_v54  ;;  %v5538_v54 = vld [vmem:[%s8075_s1 + $0x294] ss:$40 sps:$4 sm:$0xff]  }
  0xa8   :  { %3178 = vmatpush1.bf16.msra.mxu1 %v5449_v55  ;;  %3138 = vmatprep.subr.bf16.mxu0 %v5454_v56  ;;  %v5541_v55 = vld [vmem:[%s8075_s1 + $0x794] ss:$40 sps:$4 sm:$0xff]   ;;  %v5536_v56 = vld [vmem:[%s8075_s1 + $0x290] ss:$40 sps:$4 sm:$0xff]  }
  0xa9   :  { %3179 = vmatprep.subr.bf16.mxu1 %v5457_v57  ;;  %v5539_v57 = vld [vmem:[%s8075_s1 + $0x790] ss:$40 sps:$4 sm:$0xff]  }
  0xab   :  { %3139 = vmatpush1.bf16.msra.mxu0 %v5452_v58  ;;  %v5544_v58 = vld [vmem:[%s8075_s1 + $0x2e4] ss:$40 sps:$4 sm:$0xff]  }
  0xac   :  { %3180 = vmatpush1.bf16.msra.mxu1 %v5455_v59  ;;  %3140 = vmatprep.subr.bf16.mxu0 %v5460_v60  ;;  %v5547_v59 = vld [vmem:[%s8075_s1 + $0x7e4] ss:$40 sps:$4 sm:$0xff]   ;;  %v5542_v60 = vld [vmem:[%s8075_s1 + $0x2e0] ss:$40 sps:$4 sm:$0xff]  }
  0xad   :  { %3181 = vmatprep.subr.bf16.mxu1 %v5463_v61  ;;  %v5545_v61 = vld [vmem:[%s8075_s1 + $0x7e0] ss:$40 sps:$4 sm:$0xff]  }
  0xaf   :  { %3141 = vmatpush1.bf16.msra.mxu0 %v5458_v62  ;;  %v5550_v62 = vld [vmem:[%s8075_s1 + $0x334] ss:$40 sps:$4 sm:$0xff]  }
  0xb0   :  { %3182 = vmatpush1.bf16.msra.mxu1 %v5461_v63  ;;  %3142 = vmatprep.subr.bf16.mxu0 %v5466_v0  ;;  %v5553_v63 = vld [vmem:[%s8075_s1 + $0x834] ss:$40 sps:$4 sm:$0xff]   ;;  %v5548_v0 = vld [vmem:[%s8075_s1 + $0x330] ss:$40 sps:$4 sm:$0xff]  }
  0xb1   :  { %3183 = vmatprep.subr.bf16.mxu1 %v5469_v1  ;;  %v5551_v1 = vld [vmem:[%s8075_s1 + $0x830] ss:$40 sps:$4 sm:$0xff]  }
  0xb3   :  { %3143 = vmatpush1.bf16.msra.mxu0 %v5464_v2  ;;  %v5556_v2 = vld [vmem:[%s8075_s1 + $0x384] ss:$40 sps:$4 sm:$0xff]  }
  0xb4   :  { %3184 = vmatpush1.bf16.msra.mxu1 %v5467_v3  ;;  %3144 = vmatprep.subr.bf16.mxu0 %v5472_v4  ;;  %v5559_v3 = vld [vmem:[%s8075_s1 + $0x884] ss:$40 sps:$4 sm:$0xff]   ;;  %v5554_v4 = vld [vmem:[%s8075_s1 + $0x380] ss:$40 sps:$4 sm:$0xff]  }
  0xb5   :  { %3185 = vmatprep.subr.bf16.mxu1 %v5475_v5  ;;  %v5557_v5 = vld [vmem:[%s8075_s1 + $0x880] ss:$40 sps:$4 sm:$0xff]  }
  0xb7   :  { %3145 = vmatpush1.bf16.msra.mxu0 %v5470_v8  ;;  %v5562_v8 = vld [vmem:[%s8075_s1 + $0x3d4] ss:$40 sps:$4 sm:$0xff]  }
  0xb8   :  { %3186 = vmatpush1.bf16.msra.mxu1 %v5473_v9  ;;  %3146 = vmatprep.subr.bf16.mxu0 %v5478_v10  ;;  %v5565_v9 = vld [vmem:[%s8075_s1 + $0x8d4] ss:$40 sps:$4 sm:$0xff]   ;;  %v5560_v10 = vld [vmem:[%s8075_s1 + $0x3d0] ss:$40 sps:$4 sm:$0xff]  }
  0xb9   :  { %3187 = vmatprep.subr.bf16.mxu1 %v5481_v11  ;;  %v5563_v11 = vld [vmem:[%s8075_s1 + $0x8d0] ss:$40 sps:$4 sm:$0xff]  }
  0xbb   :  { %3147 = vmatpush1.bf16.msra.mxu0 %v5476_v12  ;;  %v5568_v12 = vld [vmem:[%s8075_s1 + $0x424] ss:$40 sps:$4 sm:$0xff]  }
  0xbc   :  { %3188 = vmatpush1.bf16.msra.mxu1 %v5479_v13  ;;  %3148 = vmatprep.subr.bf16.mxu0 %v5484_v15  ;;  %v5571_v13 = vld [vmem:[%s8075_s1 + $0x924] ss:$40 sps:$4 sm:$0xff]   ;;  %v5566_v15 = vld [vmem:[%s8075_s1 + $0x420] ss:$40 sps:$4 sm:$0xff]  }
  0xbd   :  { %3189 = vmatprep.subr.bf16.mxu1 %v5487_v16  ;;  %v5569_v16 = vld [vmem:[%s8075_s1 + $0x920] ss:$40 sps:$4 sm:$0xff]  }
  0xbf   :  { %3149 = vmatpush1.bf16.msra.mxu0 %v5482_v17  ;;  %v5574_v17 = vld [vmem:[%s8075_s1 + $0x474] ss:$40 sps:$4 sm:$0xff]  }
  0xc0   :  { %3190 = vmatpush1.bf16.msra.mxu1 %v5485_v18  ;;  %3200 = vmatprep.subr.bf16.mxu0 %v5490_v19  ;;  %v5577_v18 = vld [vmem:[%s8075_s1 + $0x974] ss:$40 sps:$4 sm:$0xff]   ;;  %v5572_v19 = vld [vmem:[%s8075_s1 + $0x470] ss:$40 sps:$4 sm:$0xff]  }
  0xc1   :  { %3241 = vmatprep.subr.bf16.mxu1 %v5493_v20  ;;  %v5575_v20 = vld [vmem:[%s8075_s1 + $0x970] ss:$40 sps:$4 sm:$0xff]  }
  0xc2   :  { %3151 = vmatmul.mubr.bf16.vlgmr.msra.gmra.mrb[8].mxu0 %v6175_v7 }
  0xc3   :  { %3192 = vmatmul.mubr.bf16.vlgmr.msra.gmra.mrb[8].mxu1 %v6384_v14  ;;  %3201 = vmatpush1.bf16.msra.mxu0 %v5488_v21  ;;  %v5580_v21 = vld [vmem:[%s8075_s1 + $0x4c4] ss:$40 sps:$4 sm:$0xff]  }
  0xc4   :  { %3242 = vmatpush1.bf16.msra.mxu1 %v5491_v22  ;;  %3202 = vmatprep.subr.bf16.mxu0 %v5496_v23  ;;  %v5583_v22 = vld [vmem:[%s8075_s1 + $0x9c4] ss:$40 sps:$4 sm:$0xff]   ;;  %v5578_v23 = vld [vmem:[%s8075_s1 + $0x4c0] ss:$40 sps:$4 sm:$0xff]  }
  0xc5   :  { %3243 = vmatprep.subr.bf16.mxu1 %v5499_v24  ;;  %3232 = vmatprep.mubr.bf16.mxu0 %v6104_v47  ;;  %v5581_v24 = vld [vmem:[%s8075_s1 + $0x9c0] ss:$40 sps:$4 sm:$0xff]  }
  0xc6   :  { %3273 = vmatprep.mubr.bf16.mxu1 %v6115_v51 }
  0xc7   :  { %3203 = vmatpush1.bf16.msra.mxu0 %v5494_v25  ;;  %v5586_v25 = vld [vmem:[%s8075_s1 + $0xa14] ss:$40 sps:$4 sm:$0xff]  }
  0xc8   :  { %3244 = vmatpush1.bf16.msra.mxu1 %v5497_v26  ;;  %3204 = vmatprep.subr.bf16.mxu0 %v5502_v27  ;;  %v5589_v26 = vld [vmem:[%s8075_s1 + $0x1c] ss:$40 sps:$4 sm:$0xff]   ;;  %v5584_v27 = vld [vmem:[%s8075_s1 + $0xa10] ss:$40 sps:$4 sm:$0xff]  }
  0xc9   :  { %3245 = vmatprep.subr.bf16.mxu1 %v5505_v28  ;;  %v5587_v28 = vld [vmem:[%s8075_s1 + $0x18] ss:$40 sps:$4 sm:$0xff]  }
  0xcb   :  { %3205 = vmatpush1.bf16.msra.mxu0 %v5500_v29  ;;  %v5592_v29 = vld [vmem:[%s8075_s1 + $0xa64] ss:$40 sps:$4 sm:$0xff]  }
  0xcc   :  { %3246 = vmatpush1.bf16.msra.mxu1 %v5503_v30  ;;  %3206 = vmatprep.subr.bf16.mxu0 %v5508_v31  ;;  %v5595_v30 = vld [vmem:[%s8075_s1 + $0x6c] ss:$40 sps:$4 sm:$0xff]   ;;  %v5590_v31 = vld [vmem:[%s8075_s1 + $0xa60] ss:$40 sps:$4 sm:$0xff]  }
  0xcd   :  { %3247 = vmatprep.subr.bf16.mxu1 %v5511_v32  ;;  %v5593_v32 = vld [vmem:[%s8075_s1 + $0x68] ss:$40 sps:$4 sm:$0xff]  }
  0xcf   :  { %3207 = vmatpush1.bf16.msra.mxu0 %v5506_v33  ;;  %v5598_v33 = vld [vmem:[%s8075_s1 + $0xab4] ss:$40 sps:$4 sm:$0xff]  }
  0xd0   :  { %3248 = vmatpush1.bf16.msra.mxu1 %v5509_v35  ;;  %3208 = vmatprep.subr.bf16.mxu0 %v5514_v36  ;;  %v5601_v35 = vld [vmem:[%s8075_s1 + $0xbc] ss:$40 sps:$4 sm:$0xff]   ;;  %v5596_v36 = vld [vmem:[%s8075_s1 + $0xab0] ss:$40 sps:$4 sm:$0xff]  }
  0xd1   :  { %3249 = vmatprep.subr.bf16.mxu1 %v5517_v37  ;;  %v5599_v37 = vld [vmem:[%s8075_s1 + $0xb8] ss:$40 sps:$4 sm:$0xff]  }
  0xd3   :  { %3209 = vmatpush1.bf16.msra.mxu0 %v5512_v38  ;;  %v5604_v38 = vld [vmem:[%s8075_s1 + $0xb04] ss:$40 sps:$4 sm:$0xff]  }
  0xd4   :  { %3250 = vmatpush1.bf16.msra.mxu1 %v5515_v39  ;;  %3210 = vmatprep.subr.bf16.mxu0 %v5520_v40  ;;  %v5607_v39 = vld [vmem:[%s8075_s1 + $0x10c] ss:$40 sps:$4 sm:$0xff]   ;;  %v5602_v40 = vld [vmem:[%s8075_s1 + $0xb00] ss:$40 sps:$4 sm:$0xff]  }
  0xd5   :  { %3251 = vmatprep.subr.bf16.mxu1 %v5523_v41  ;;  %v5605_v41 = vld [vmem:[%s8075_s1 + $0x108] ss:$40 sps:$4 sm:$0xff]  }
  0xd7   :  { %3211 = vmatpush1.bf16.msra.mxu0 %v5518_v42  ;;  %v5610_v42 = vld [vmem:[%s8075_s1 + $0xb54] ss:$40 sps:$4 sm:$0xff]  }
  0xd8   :  { %3252 = vmatpush1.bf16.msra.mxu1 %v5521_v43  ;;  %3212 = vmatprep.subr.bf16.mxu0 %v5526_v44  ;;  %v5613_v43 = vld [vmem:[%s8075_s1 + $0x15c] ss:$40 sps:$4 sm:$0xff]   ;;  %v5608_v44 = vld [vmem:[%s8075_s1 + $0xb50] ss:$40 sps:$4 sm:$0xff]  }
  0xd9   :  { %3253 = vmatprep.subr.bf16.mxu1 %v5529_v45  ;;  %v5611_v45 = vld [vmem:[%s8075_s1 + $0x158] ss:$40 sps:$4 sm:$0xff]  }
  0xdb   :  { %3213 = vmatpush1.bf16.msra.mxu0 %v5524_v46  ;;  %v5616_v46 = vld [vmem:[%s8075_s1 + $0xba4] ss:$40 sps:$4 sm:$0xff]  }
  0xdc   :  { %3254 = vmatpush1.bf16.msra.mxu1 %v5527_v48  ;;  %3214 = vmatprep.subr.bf16.mxu0 %v5532_v49  ;;  %v5619_v48 = vld [vmem:[%s8075_s1 + $0x1ac] ss:$40 sps:$4 sm:$0xff]   ;;  %v5614_v49 = vld [vmem:[%s8075_s1 + $0xba0] ss:$40 sps:$4 sm:$0xff]  }
  0xdd   :  { %3255 = vmatprep.subr.bf16.mxu1 %v5535_v50  ;;  %v5617_v50 = vld [vmem:[%s8075_s1 + $0x1a8] ss:$40 sps:$4 sm:$0xff]  }
  0xdf   :  { %3215 = vmatpush1.bf16.msra.mxu0 %v5530_v52  ;;  %v5622_v52 = vld [vmem:[%s8075_s1 + $0xbf4] ss:$40 sps:$4 sm:$0xff]  }
  0xe0   :  { %3256 = vmatpush1.bf16.msra.mxu1 %v5533_v53  ;;  %3216 = vmatprep.subr.bf16.mxu0 %v5538_v54  ;;  %v5625_v53 = vld [vmem:[%s8075_s1 + $0x1fc] ss:$40 sps:$4 sm:$0xff]  }
  0xe1   :  { %3257 = vmatprep.subr.bf16.mxu1 %v5541_v55 }
  0xe3   :  { %3217 = vmatpush1.bf16.msra.mxu0 %v5536_v56  ;;  %v5620_v56 = vld [vmem:[%s8075_s1 + $0xbf0] ss:$40 sps:$4 sm:$0xff]  }
  0xe4   :  { %3258 = vmatpush1.bf16.msra.mxu1 %v5539_v57  ;;  %3218 = vmatprep.subr.bf16.mxu0 %v5544_v58  ;;  %v5623_v57 = vld [vmem:[%s8075_s1 + $0x1f8] ss:$40 sps:$4 sm:$0xff]  }
  0xe5   :  { %3259 = vmatprep.subr.bf16.mxu1 %v5547_v59 }
  0xe7   :  { %3219 = vmatpush1.bf16.msra.mxu0 %v5542_v60 }
  0xe8   :  { %3260 = vmatpush1.bf16.msra.mxu1 %v5545_v61  ;;  %3220 = vmatprep.subr.bf16.mxu0 %v5550_v62 }
  0xe9   :  { %3261 = vmatprep.subr.bf16.mxu1 %v5553_v63 }
  0xeb   :  { %3221 = vmatpush1.bf16.msra.mxu0 %v5548_v0 }
  0xec   :  { %3262 = vmatpush1.bf16.msra.mxu1 %v5551_v1  ;;  %3222 = vmatprep.subr.bf16.mxu0 %v5556_v2  ;;  %v5628_v1 = vld [vmem:[%s8075_s1 + $0xc44] ss:$40 sps:$4 sm:$0xff]  }
  0xed   :  { %3263 = vmatprep.subr.bf16.mxu1 %v5559_v3  ;;  %v5631_v2 = vld [vmem:[%s8075_s1 + $0x24c] ss:$40 sps:$4 sm:$0xff]  }
  0xef   :  { %3223 = vmatpush1.bf16.msra.mxu0 %v5554_v4  ;;  %v5626_v4 = vld [vmem:[%s8075_s1 + $0xc40] ss:$40 sps:$4 sm:$0xff]  }
  0xf0   :  { %3264 = vmatpush1.bf16.msra.mxu1 %v5557_v5  ;;  %3224 = vmatprep.subr.bf16.mxu0 %v5562_v8  ;;  %v5629_v5 = vld [vmem:[%s8075_s1 + $0x248] ss:$40 sps:$4 sm:$0xff]   ;;  %v5634_v8 = vld [vmem:[%s8075_s1 + $0xc94] ss:$40 sps:$4 sm:$0xff]  }
  0xf1   :  { %3265 = vmatprep.subr.bf16.mxu1 %v5565_v9  ;;  %v5637_v9 = vld [vmem:[%s8075_s1 + $0x29c] ss:$40 sps:$4 sm:$0xff]  }
  0xf3   :  { %3225 = vmatpush1.bf16.msra.mxu0 %v5560_v10  ;;  %v5632_v10 = vld [vmem:[%s8075_s1 + $0xc90] ss:$40 sps:$4 sm:$0xff]  }
  0xf4   :  { %3266 = vmatpush1.bf16.msra.mxu1 %v5563_v11  ;;  %3226 = vmatprep.subr.bf16.mxu0 %v5568_v12  ;;  %v5635_v11 = vld [vmem:[%s8075_s1 + $0x298] ss:$40 sps:$4 sm:$0xff]   ;;  %v5640_v12 = vld [vmem:[%s8075_s1 + $0xce4] ss:$40 sps:$4 sm:$0xff]  }
  0xf5   :  { %3267 = vmatprep.subr.bf16.mxu1 %v5571_v13  ;;  %v5643_v13 = vld [vmem:[%s8075_s1 + $0x2ec] ss:$40 sps:$4 sm:$0xff]  }
  0xf7   :  { %3227 = vmatpush1.bf16.msra.mxu0 %v5566_v15  ;;  %v5638_v15 = vld [vmem:[%s8075_s1 + $0xce0] ss:$40 sps:$4 sm:$0xff]  }
  0xf8   :  { %3268 = vmatpush1.bf16.msra.mxu1 %v5569_v16  ;;  %3228 = vmatprep.subr.bf16.mxu0 %v5574_v17  ;;  %v5641_v16 = vld [vmem:[%s8075_s1 + $0x2e8] ss:$40 sps:$4 sm:$0xff]   ;;  %v5646_v17 = vld [vmem:[%s8075_s1 + $0xd34] ss:$40 sps:$4 sm:$0xff]  }
  0xf9   :  { %3269 = vmatprep.subr.bf16.mxu1 %v5577_v18  ;;  %v5649_v18 = vld [vmem:[%s8075_s1 + $0x33c] ss:$40 sps:$4 sm:$0xff]  }
  0xfb   :  { %3229 = vmatpush1.bf16.msra.mxu0 %v5572_v19  ;;  %v5644_v19 = vld [vmem:[%s8075_s1 + $0xd30] ss:$40 sps:$4 sm:$0xff]  }
  0xfc   :  { %3270 = vmatpush1.bf16.msra.mxu1 %v5575_v20  ;;  %3230 = vmatprep.subr.bf16.mxu0 %v5580_v21  ;;  %v5647_v20 = vld [vmem:[%s8075_s1 + $0x338] ss:$40 sps:$4 sm:$0xff]   ;;  %v5652_v21 = vld [vmem:[%s8075_s1 + $0xd84] ss:$40 sps:$4 sm:$0xff]  }
  0xfd   :  { %3271 = vmatprep.subr.bf16.mxu1 %v5583_v22  ;;  %v5655_v22 = vld [vmem:[%s8075_s1 + $0x38c] ss:$40 sps:$4 sm:$0xff]  }
  0xff   :  { %3231 = vmatpush1.bf16.msra.mxu0 %v5578_v23  ;;  %v5650_v23 = vld [vmem:[%s8075_s1 + $0xd80] ss:$40 sps:$4 sm:$0xff]  }
 0x100   :  { %3272 = vmatpush1.bf16.msra.mxu1 %v5581_v24  ;;  %3282 = vmatprep.subr.bf16.mxu0 %v5586_v25  ;;  %v5653_v24 = vld [vmem:[%s8075_s1 + $0x388] ss:$40 sps:$4 sm:$0xff]   ;;  %v5658_v25 = vld [vmem:[%s8075_s1 + $0xdd4] ss:$40 sps:$4 sm:$0xff]  }
 0x101   :  { %3323 = vmatprep.subr.bf16.mxu1 %v5589_v26  ;;  %v5661_v26 = vld [vmem:[%s8075_s1 + $0x3dc] ss:$40 sps:$4 sm:$0xff]  }
 0x102   :  { %3233 = vmatmul.mubr.bf16.vlgmr.msra.gmra.mrb[12].mxu0 %v6173_v6 }
 0x103   :  { %3274 = vmatmul.mubr.bf16.vlgmr.msra.gmra.mrb[12].mxu1 %v6175_v7  ;;  %3283 = vmatpush1.bf16.msra.mxu0 %v5584_v27  ;;  %v5656_v27 = vld [vmem:[%s8075_s1 + $0xdd0] ss:$40 sps:$4 sm:$0xff]  }
 0x104   :  { %3324 = vmatpush1.bf16.msra.mxu1 %v5587_v28  ;;  %3284 = vmatprep.subr.bf16.mxu0 %v5592_v29  ;;  %v5659_v28 = vld [vmem:[%s8075_s1 + $0x3d8] ss:$40 sps:$4 sm:$0xff]   ;;  %v5664_v29 = vld [vmem:[%s8075_s1 + $0xe24] ss:$40 sps:$4 sm:$0xff]  }
 0x105   :  { %3325 = vmatprep.subr.bf16.mxu1 %v5595_v30  ;;  %3314 = vmatprep.mubr.bf16.mxu0 %v6262_v34  ;;  %v5667_v30 = vld [vmem:[%s8075_s1 + $0x42c] ss:$40 sps:$4 sm:$0xff]  }
 0x106   :  { %3355 = vmatprep.mubr.bf16.mxu1 %v6104_v47 }
 0x107   :  { %3285 = vmatpush1.bf16.msra.mxu0 %v5590_v31  ;;  %v5662_v31 = vld [vmem:[%s8075_s1 + $0xe20] ss:$40 sps:$4 sm:$0xff]  }
 0x108   :  { %3326 = vmatpush1.bf16.msra.mxu1 %v5593_v32  ;;  %3286 = vmatprep.subr.bf16.mxu0 %v5598_v33  ;;  %v5665_v32 = vld [vmem:[%s8075_s1 + $0x428] ss:$40 sps:$4 sm:$0xff]   ;;  %v5670_v33 = vld [vmem:[%s8075_s1 + $0xe74] ss:$40 sps:$4 sm:$0xff]  }
 0x109   :  { %3327 = vmatprep.subr.bf16.mxu1 %v5601_v35  ;;  %v5673_v35 = vld [vmem:[%s8075_s1 + $0x47c] ss:$40 sps:$4 sm:$0xff]  }
 0x10b   :  { %3287 = vmatpush1.bf16.msra.mxu0 %v5596_v36  ;;  %v5668_v36 = vld [vmem:[%s8075_s1 + $0xe70] ss:$40 sps:$4 sm:$0xff]  }
 0x10c   :  { %3328 = vmatpush1.bf16.msra.mxu1 %v5599_v37  ;;  %3288 = vmatprep.subr.bf16.mxu0 %v5604_v38  ;;  %v5671_v37 = vld [vmem:[%s8075_s1 + $0x478] ss:$40 sps:$4 sm:$0xff]   ;;  %v5676_v38 = vld [vmem:[%s8075_s1 + $0xec4] ss:$40 sps:$4 sm:$0xff]  }
 0x10d   :  { %3329 = vmatprep.subr.bf16.mxu1 %v5607_v39  ;;  %v5679_v39 = vld [vmem:[%s8075_s1 + $0x4cc] ss:$40 sps:$4 sm:$0xff]  }
 0x10f   :  { %3289 = vmatpush1.bf16.msra.mxu0 %v5602_v40  ;;  %v5674_v40 = vld [vmem:[%s8075_s1 + $0xec0] ss:$40 sps:$4 sm:$0xff]  }
 0x110   :  { %3330 = vmatpush1.bf16.msra.mxu1 %v5605_v41  ;;  %3290 = vmatprep.subr.bf16.mxu0 %v5610_v42  ;;  %v5677_v41 = vld [vmem:[%s8075_s1 + $0x4c8] ss:$40 sps:$4 sm:$0xff]   ;;  %v5682_v42 = vld [vmem:[%s8075_s1 + $0x51c] ss:$40 sps:$4 sm:$0xff]  }
 0x111   :  { %3331 = vmatprep.subr.bf16.mxu1 %v5613_v43  ;;  %v5685_v43 = vld [vmem:[%s8075_s1 + $0xa1c] ss:$40 sps:$4 sm:$0xff]  }
 0x113   :  { %3291 = vmatpush1.bf16.msra.mxu0 %v5608_v44  ;;  %v5680_v44 = vld [vmem:[%s8075_s1 + $0x518] ss:$40 sps:$4 sm:$0xff]  }
 0x114   :  { %3332 = vmatpush1.bf16.msra.mxu1 %v5611_v45  ;;  %3292 = vmatprep.subr.bf16.mxu0 %v5616_v46  ;;  %v5683_v45 = vld [vmem:[%s8075_s1 + $0xa18] ss:$40 sps:$4 sm:$0xff]   ;;  %v5688_v46 = vld [vmem:[%s8075_s1 + $0x56c] ss:$40 sps:$4 sm:$0xff]  }
 0x115   :  { %3333 = vmatprep.subr.bf16.mxu1 %v5619_v48  ;;  %v2988_v54 = vpop.f32.mrb[0].mxu0  ;;  %v5691_v48 = vld [vmem:[%s8075_s1 + $0xa6c] ss:$40 sps:$4 sm:$0xff]  }
 0x116   :  { %v3029_v55 = vpop.f32.mrb[0].mxu1  ;;  %v2990_v59 = vpop.f32.mrb[1].mxu0 }
 0x117   :  { %v6860_v58 = vadd.f32 %v3029_v55, %v2988_v54  ;;  %v3031_v60 = vpop.f32.mrb[1].mxu1  ;;  %v2992_v62 = vpop.f32.mrb[2].mxu0  ;;  %3293 = vmatpush1.bf16.msra.mxu0 %v5614_v49  ;;  %v5686_v49 = vld [vmem:[%s8075_s1 + $0x568] ss:$40 sps:$4 sm:$0xff]   ;;  %v5692_v54 = vld [vmem:[%s8075_s1 + $0x5b8] ss:$40 sps:$4 sm:$0xff]  }
 0x118   :  { %v6862_v61 = vadd.f32 %v3031_v60, %v2990_v59  ;;  %3334 = vmatpush1.bf16.msra.mxu1 %v5617_v50  ;;  %v3033_v63 = vpop.f32.mrb[2].mxu1  ;;  %v2993_v0 = vpop.f32.mrb[3].mxu0  ;;  %3294 = vmatprep.subr.bf16.mxu0 %v5622_v52  ;;  %v5689_v50 = vld [vmem:[%s8075_s1 + $0xa68] ss:$40 sps:$4 sm:$0xff]   ;;  %v5694_v52 = vld [vmem:[%s8075_s1 + $0x5bc] ss:$40 sps:$4 sm:$0xff]  }
 0x119   :  { %3335 = vmatprep.subr.bf16.mxu1 %v5625_v53  ;;  %v3034_v3 = vpop.f32.mrb[3].mxu1  ;;  %v5697_v53 = vld [vmem:[%s8075_s1 + $0xabc] ss:$40 sps:$4 sm:$0xff]   ;;  %v5695_v55 = vld [vmem:[%s8075_s1 + $0xab8] ss:$40 sps:$4 sm:$0xff]  }
 0x11a   :  { %v5698_v59 = vld [vmem:[%s8075_s1 + $0x608] ss:$40 sps:$4 sm:$0xff]   ;;  %v5706_v62 = vld [vmem:[%s8075_s1 + $0x65c] ss:$40 sps:$4 sm:$0xff]   ;;  %v5704_v0 = vld [vmem:[%s8075_s1 + $0x658] ss:$40 sps:$4 sm:$0xff]  }
 0x11b   :  { %3295 = vmatpush1.bf16.msra.mxu0 %v5620_v56  ;;  %v5700_v56 = vld [vmem:[%s8075_s1 + $0x60c] ss:$40 sps:$4 sm:$0xff]   ;;  %v5701_v60 = vld [vmem:[%s8075_s1 + $0xb08] ss:$40 sps:$4 sm:$0xff]   ;;  %v5709_v63 = vld [vmem:[%s8075_s1 + $0xb5c] ss:$40 sps:$4 sm:$0xff]  }
 0x11c   :  { %3336 = vmatpush1.bf16.msra.mxu1 %v5623_v57  ;;  %3296 = vmatprep.subr.bf16.mxu0 %v5628_v1  ;;  %v5703_v57 = vld [vmem:[%s8075_s1 + $0xb0c] ss:$40 sps:$4 sm:$0xff]   ;;  %v5707_v1 = vld [vmem:[%s8075_s1 + $0xb58] ss:$40 sps:$4 sm:$0xff]  }
 0x11d   :  { %3337 = vmatprep.subr.bf16.mxu1 %v5631_v2  ;;  %v5712_v2 = vld [vmem:[%s8075_s1 + $0x6ac] ss:$40 sps:$4 sm:$0xff]  }
 0x11e   :  { %v5715_v3 = vld [vmem:[%s8075_s1 + $0xbac] ss:$40 sps:$4 sm:$0xff]  }
 0x11f   :  { %3297 = vmatpush1.bf16.msra.mxu0 %v5626_v4  ;;  %v5710_v4 = vld [vmem:[%s8075_s1 + $0x6a8] ss:$40 sps:$4 sm:$0xff]  }
 0x120   :  { %3338 = vmatpush1.bf16.msra.mxu1 %v5629_v5  ;;  %3298 = vmatprep.subr.bf16.mxu0 %v5634_v8  ;;  %v5713_v5 = vld [vmem:[%s8075_s1 + $0xba8] ss:$40 sps:$4 sm:$0xff]   ;;  %v5718_v8 = vld [vmem:[%s8075_s1 + $0x6fc] ss:$40 sps:$4 sm:$0xff]  }
 0x121   :  { %3339 = vmatprep.subr.bf16.mxu1 %v5637_v9  ;;  %v5721_v9 = vld [vmem:[%s8075_s1 + $0xbfc] ss:$40 sps:$4 sm:$0xff]  }
 0x123   :  { %3299 = vmatpush1.bf16.msra.mxu0 %v5632_v10 }
 0x124   :  { %3340 = vmatpush1.bf16.msra.mxu1 %v5635_v11  ;;  %3300 = vmatprep.subr.bf16.mxu0 %v5640_v12 }
 0x125   :  { %3341 = vmatprep.subr.bf16.mxu1 %v5643_v13 }
 0x127   :  { %3301 = vmatpush1.bf16.msra.mxu0 %v5638_v15 }
 0x128   :  { %3342 = vmatpush1.bf16.msra.mxu1 %v5641_v16  ;;  %3302 = vmatprep.subr.bf16.mxu0 %v5646_v17 }
 0x129   :  { %3343 = vmatprep.subr.bf16.mxu1 %v5649_v18  ;;  %v5716_v18 = vld [vmem:[%s8075_s1 + $0x6f8] ss:$40 sps:$4 sm:$0xff]  }
 0x12b   :  { %3303 = vmatpush1.bf16.msra.mxu0 %v5644_v19  ;;  %v5719_v19 = vld [vmem:[%s8075_s1 + $0xbf8] ss:$40 sps:$4 sm:$0xff]  }
 0x12c   :  { %3344 = vmatpush1.bf16.msra.mxu1 %v5647_v20  ;;  %3304 = vmatprep.subr.bf16.mxu0 %v5652_v21  ;;  %v5727_v21 = vld [vmem:[%s8075_s1 + $0xc4c] ss:$40 sps:$4 sm:$0xff]  }
 0x12d   :  { %3345 = vmatprep.subr.bf16.mxu1 %v5655_v22 }
 0x12f   :  { %3305 = vmatpush1.bf16.msra.mxu0 %v5650_v23  ;;  %v5722_v23 = vld [vmem:[%s8075_s1 + $0x748] ss:$40 sps:$4 sm:$0xff]  }
 0x130   :  { %3346 = vmatpush1.bf16.msra.mxu1 %v5653_v24  ;;  %3306 = vmatprep.subr.bf16.mxu0 %v5658_v25  ;;  %v5725_v24 = vld [vmem:[%s8075_s1 + $0xc48] ss:$40 sps:$4 sm:$0xff]   ;;  %v5730_v25 = vld [vmem:[%s8075_s1 + $0x79c] ss:$40 sps:$4 sm:$0xff]  }
 0x131   :  { %3347 = vmatprep.subr.bf16.mxu1 %v5661_v26  ;;  %v5733_v26 = vld [vmem:[%s8075_s1 + $0xc9c] ss:$40 sps:$4 sm:$0xff]  }
 0x133   :  { %3307 = vmatpush1.bf16.msra.mxu0 %v5656_v27  ;;  %v5728_v27 = vld [vmem:[%s8075_s1 + $0x798] ss:$40 sps:$4 sm:$0xff]  }
 0x134   :  { %3348 = vmatpush1.bf16.msra.mxu1 %v5659_v28  ;;  %3308 = vmatprep.subr.bf16.mxu0 %v5664_v29  ;;  %v5731_v28 = vld [vmem:[%s8075_s1 + $0xc98] ss:$40 sps:$4 sm:$0xff]   ;;  %v5736_v29 = vld [vmem:[%s8075_s1 + $0x7ec] ss:$40 sps:$4 sm:$0xff]  }
 0x135   :  { %3349 = vmatprep.subr.bf16.mxu1 %v5667_v30  ;;  %v5739_v30 = vld [vmem:[%s8075_s1 + $0xcec] ss:$40 sps:$4 sm:$0xff]  }
 0x137   :  { %3309 = vmatpush1.bf16.msra.mxu0 %v5662_v31  ;;  %v5734_v31 = vld [vmem:[%s8075_s1 + $0x7e8] ss:$40 sps:$4 sm:$0xff]  }
 0x138   :  { %3350 = vmatpush1.bf16.msra.mxu1 %v5665_v32  ;;  %3310 = vmatprep.subr.bf16.mxu0 %v5670_v33  ;;  %v5737_v32 = vld [vmem:[%s8075_s1 + $0xce8] ss:$40 sps:$4 sm:$0xff]   ;;  %v5742_v33 = vld [vmem:[%s8075_s1 + $0x83c] ss:$40 sps:$4 sm:$0xff]  }
 0x139   :  { %3351 = vmatprep.subr.bf16.mxu1 %v5673_v35  ;;  %v5745_v35 = vld [vmem:[%s8075_s1 + $0xd3c] ss:$40 sps:$4 sm:$0xff]  }
 0x13b   :  { %3311 = vmatpush1.bf16.msra.mxu0 %v5668_v36  ;;  %v5740_v36 = vld [vmem:[%s8075_s1 + $0x838] ss:$40 sps:$4 sm:$0xff]  }
 0x13c   :  { %3352 = vmatpush1.bf16.msra.mxu1 %v5671_v37  ;;  %3312 = vmatprep.subr.bf16.mxu0 %v5676_v38  ;;  %v5743_v37 = vld [vmem:[%s8075_s1 + $0xd38] ss:$40 sps:$4 sm:$0xff]   ;;  %v5748_v38 = vld [vmem:[%s8075_s1 + $0x88c] ss:$40 sps:$4 sm:$0xff]  }
 0x13d   :  { %3353 = vmatprep.subr.bf16.mxu1 %v5679_v39  ;;  %v5751_v39 = vld [vmem:[%s8075_s1 + $0xd8c] ss:$40 sps:$4 sm:$0xff]  }
 0x13f   :  { %3313 = vmatpush1.bf16.msra.mxu0 %v5674_v40  ;;  %v5746_v40 = vld [vmem:[%s8075_s1 + $0x888] ss:$40 sps:$4 sm:$0xff]  }
 0x140   :  { %3354 = vmatpush1.bf16.msra.mxu1 %v5677_v41  ;;  %3364 = vmatprep.subr.bf16.mxu0 %v5682_v42  ;;  %v5749_v41 = vld [vmem:[%s8075_s1 + $0xd88] ss:$40 sps:$4 sm:$0xff]   ;;  %v5754_v42 = vld [vmem:[%s8075_s1 + $0x8dc] ss:$40 sps:$4 sm:$0xff]  }
 0x141   :  { %3405 = vmatprep.subr.bf16.mxu1 %v5685_v43  ;;  %v5757_v43 = vld [vmem:[%s8075_s1 + $0xddc] ss:$40 sps:$4 sm:$0xff]  }
 0x142   :  { %3315 = vmatmul.mubr.bf16.vlgmr.msra.gmra.mrb[16].mxu0 %v6384_v14 }
 0x143   :  { %3356 = vmatmul.mubr.bf16.vlgmr.msra.gmra.mrb[16].mxu1 %v6173_v6  ;;  %3365 = vmatpush1.bf16.msra.mxu0 %v5680_v44  ;;  %v5752_v44 = vld [vmem:[%s8075_s1 + $0x8d8] ss:$40 sps:$4 sm:$0xff]  }
 0x144   :  { %3406 = vmatpush1.bf16.msra.mxu1 %v5683_v45  ;;  %3366 = vmatprep.subr.bf16.mxu0 %v5688_v46  ;;  %v5755_v45 = vld [vmem:[%s8075_s1 + $0xdd8] ss:$40 sps:$4 sm:$0xff]   ;;  %v5760_v46 = vld [vmem:[%s8075_s1 + $0x92c] ss:$40 sps:$4 sm:$0xff]  }
 0x145   :  { %3407 = vmatprep.subr.bf16.mxu1 %v5691_v48  ;;  %3396 = vmatprep.mubr.bf16.mxu0 %v6115_v51  ;;  %v5763_v48 = vld [vmem:[%s8075_s1 + $0xe2c] ss:$40 sps:$4 sm:$0xff]  }
 0x146   :  { %3437 = vmatprep.mubr.bf16.mxu1 %v6262_v34 }
 0x147   :  { %3367 = vmatpush1.bf16.msra.mxu0 %v5686_v49  ;;  %v5758_v49 = vld [vmem:[%s8075_s1 + $0x928] ss:$40 sps:$4 sm:$0xff]  }
 0x148   :  { %3408 = vmatpush1.bf16.msra.mxu1 %v5689_v50  ;;  %3368 = vmatprep.subr.bf16.mxu0 %v5694_v52  ;;  %v5761_v50 = vld [vmem:[%s8075_s1 + $0xe28] ss:$40 sps:$4 sm:$0xff]   ;;  %v5766_v52 = vld [vmem:[%s8075_s1 + $0x97c] ss:$40 sps:$4 sm:$0xff]  }
 0x149   :  { %3409 = vmatprep.subr.bf16.mxu1 %v5697_v53  ;;  %v5769_v53 = vld [vmem:[%s8075_s1 + $0xe7c] ss:$40 sps:$4 sm:$0xff]  }
 0x14b   :  { %3369 = vmatpush1.bf16.msra.mxu0 %v5692_v54  ;;  %v5764_v54 = vld [vmem:[%s8075_s1 + $0x978] ss:$40 sps:$4 sm:$0xff]  }
 0x14c   :  { %3410 = vmatpush1.bf16.msra.mxu1 %v5695_v55  ;;  %3370 = vmatprep.subr.bf16.mxu0 %v5700_v56  ;;  %v5767_v55 = vld [vmem:[%s8075_s1 + $0xe78] ss:$40 sps:$4 sm:$0xff]   ;;  %v5772_v56 = vld [vmem:[%s8075_s1 + $0x9cc] ss:$40 sps:$4 sm:$0xff]  }
 0x14d   :  { %3411 = vmatprep.subr.bf16.mxu1 %v5703_v57  ;;  %v5775_v57 = vld [vmem:[%s8075_s1 + $0xecc] ss:$40 sps:$4 sm:$0xff]  }
 0x14f   :  { %3371 = vmatpush1.bf16.msra.mxu0 %v5698_v59  ;;  %v5770_v59 = vld [vmem:[%s8075_s1 + $0x9c8] ss:$40 sps:$4 sm:$0xff]  }
 0x150   :  { %3412 = vmatpush1.bf16.msra.mxu1 %v5701_v60  ;;  %3372 = vmatprep.subr.bf16.mxu0 %v5706_v62  ;;  %v5773_v60 = vld [vmem:[%s8075_s1 + $0xec8] ss:$40 sps:$4 sm:$0xff]   ;;  %v5778_v62 = vld [vmem:[%s8075_s1 + $0x24] ss:$40 sps:$4 sm:$0xff]  }
 0x151   :  { %3413 = vmatprep.subr.bf16.mxu1 %v5709_v63  ;;  %v5781_v63 = vld [vmem:[%s8075_s1 + $0x524] ss:$40 sps:$4 sm:$0xff]  }
 0x153   :  { %3373 = vmatpush1.bf16.msra.mxu0 %v5704_v0  ;;  %v5776_v0 = vld [vmem:[%s8075_s1 + $0x20] ss:$40 sps:$4 sm:$0xff]  }
 0x154   :  { %3414 = vmatpush1.bf16.msra.mxu1 %v5707_v1  ;;  %3374 = vmatprep.subr.bf16.mxu0 %v5712_v2  ;;  %v5779_v1 = vld [vmem:[%s8075_s1 + $0x520] ss:$40 sps:$4 sm:$0xff]   ;;  %v5784_v2 = vld [vmem:[%s8075_s1 + $0x74] ss:$40 sps:$4 sm:$0xff]  }
 0x155   :  { %3415 = vmatprep.subr.bf16.mxu1 %v5715_v3  ;;  %v3070_v10 = vpop.f32.mrb[4].mxu0  ;;  %v5787_v3 = vld [vmem:[%s8075_s1 + $0x574] ss:$40 sps:$4 sm:$0xff]  }
 0x156   :  { %v7054_v11 = vpop.f32.mrb[4].mxu1  ;;  %v7057_v12 = vadd.f32 %v3070_v10, %v6860_v58  ;;  %v3072_v13 = vpop.f32.mrb[5].mxu0  ;;  %v5788_v10 = vld [vmem:[%s8075_s1 + $0xc0] ss:$40 sps:$4 sm:$0xff]  }
 0x157   :  { %v7059_v15 = vpop.f32.mrb[5].mxu1  ;;  %v7062_v16 = vadd.f32 %v3072_v13, %v6862_v61  ;;  %v3074_v17 = vpop.f32.mrb[6].mxu0  ;;  %3375 = vmatpush1.bf16.msra.mxu0 %v5710_v4  ;;  %v5724_v61 = vld [vmem:[%s8075_s1 + $0x74c] ss:$40 sps:$4 sm:$0xff]   ;;  %v5782_v4 = vld [vmem:[%s8075_s1 + $0x70] ss:$40 sps:$4 sm:$0xff]  }
 0x158   :  { %3416 = vmatpush1.bf16.msra.mxu1 %v5713_v5  ;;  %v3115_v20 = vpop.f32.mrb[6].mxu1  ;;  %v3075_v58 = vpop.f32.mrb[7].mxu0  ;;  %3376 = vmatprep.subr.bf16.mxu0 %v5718_v8  ;;  %v5785_v5 = vld [vmem:[%s8075_s1 + $0x570] ss:$40 sps:$4 sm:$0xff]   ;;  %v5790_v8 = vld [vmem:[%s8075_s1 + $0xc4] ss:$40 sps:$4 sm:$0xff]  }
 0x159   :  { %3417 = vmatprep.subr.bf16.mxu1 %v5721_v9  ;;  %v3116_v22 = vpop.f32.mrb[7].mxu1  ;;  %v5793_v9 = vld [vmem:[%s8075_s1 + $0x5c4] ss:$40 sps:$4 sm:$0xff]   ;;  %v5791_v13 = vld [vmem:[%s8075_s1 + $0x5c0] ss:$40 sps:$4 sm:$0xff]  }
 0x15a   :  { %v5796_v17 = vld [vmem:[%s8075_s1 + $0x114] ss:$40 sps:$4 sm:$0xff]   ;;  %v5805_v20 = vld [vmem:[%s8075_s1 + $0x664] ss:$40 sps:$4 sm:$0xff]   ;;  %v5800_v58 = vld [vmem:[%s8075_s1 + $0x160] ss:$40 sps:$4 sm:$0xff]  }
 0x15b   :  { %3377 = vmatpush1.bf16.msra.mxu0 %v5716_v18  ;;  %v5797_v18 = vld [vmem:[%s8075_s1 + $0x610] ss:$40 sps:$4 sm:$0xff]   ;;  %v5811_v22 = vld [vmem:[%s8075_s1 + $0x6b4] ss:$40 sps:$4 sm:$0xff]  }
 0x15c   :  { %3418 = vmatpush1.bf16.msra.mxu1 %v5719_v19  ;;  %3378 = vmatprep.subr.bf16.mxu0 %v5724_v61  ;;  %v5802_v19 = vld [vmem:[%s8075_s1 + $0x164] ss:$40 sps:$4 sm:$0xff]   ;;  %v5803_v61 = vld [vmem:[%s8075_s1 + $0x660] ss:$40 sps:$4 sm:$0xff]  }
 0x15d   :  { %3419 = vmatprep.subr.bf16.mxu1 %v5727_v21  ;;  %v5808_v21 = vld [vmem:[%s8075_s1 + $0x1b4] ss:$40 sps:$4 sm:$0xff]  }
 0x15f   :  { %3379 = vmatpush1.bf16.msra.mxu0 %v5722_v23  ;;  %v5806_v23 = vld [vmem:[%s8075_s1 + $0x1b0] ss:$40 sps:$4 sm:$0xff]  }
 0x160   :  { %3420 = vmatpush1.bf16.msra.mxu1 %v5725_v24  ;;  %3380 = vmatprep.subr.bf16.mxu0 %v5730_v25  ;;  %v5809_v24 = vld [vmem:[%s8075_s1 + $0x6b0] ss:$40 sps:$4 sm:$0xff]   ;;  %v5814_v25 = vld [vmem:[%s8075_s1 + $0x204] ss:$40 sps:$4 sm:$0xff]  }
 0x161   :  { %3421 = vmatprep.subr.bf16.mxu1 %v5733_v26  ;;  %v5817_v26 = vld [vmem:[%s8075_s1 + $0x704] ss:$40 sps:$4 sm:$0xff]  }
 0x163   :  { %3381 = vmatpush1.bf16.msra.mxu0 %v5728_v27 }
 0x164   :  { %3422 = vmatpush1.bf16.msra.mxu1 %v5731_v28  ;;  %3382 = vmatprep.subr.bf16.mxu0 %v5736_v29 }
 0x165   :  { %3423 = vmatprep.subr.bf16.mxu1 %v5739_v30 }
 0x167   :  { %3383 = vmatpush1.bf16.msra.mxu0 %v5734_v31 }
 0x168   :  { %3424 = vmatpush1.bf16.msra.mxu1 %v5737_v32  ;;  %3384 = vmatprep.subr.bf16.mxu0 %v5742_v33 }
 0x169   :  { %3425 = vmatprep.subr.bf16.mxu1 %v5745_v35  ;;  %v5812_v35 = vld [vmem:[%s8075_s1 + $0x200] ss:$40 sps:$4 sm:$0xff]  }
 0x16b   :  { %3385 = vmatpush1.bf16.msra.mxu0 %v5740_v36  ;;  %v5815_v36 = vld [vmem:[%s8075_s1 + $0x700] ss:$40 sps:$4 sm:$0xff]  }
 0x16c   :  { %3426 = vmatpush1.bf16.msra.mxu1 %v5743_v37  ;;  %3386 = vmatprep.subr.bf16.mxu0 %v5748_v38 }
 0x16d   :  { %3427 = vmatprep.subr.bf16.mxu1 %v5751_v39 }
 0x16f   :  { %3387 = vmatpush1.bf16.msra.mxu0 %v5746_v40 }
 0x170   :  { %3428 = vmatpush1.bf16.msra.mxu1 %v5749_v41  ;;  %3388 = vmatprep.subr.bf16.mxu0 %v5754_v42  ;;  %v5818_v42 = vld [vmem:[%s8075_s1 + $0x250] ss:$40 sps:$4 sm:$0xff]  }
 0x171   :  { %3429 = vmatprep.subr.bf16.mxu1 %v5757_v43  ;;  %v5821_v43 = vld [vmem:[%s8075_s1 + $0x750] ss:$40 sps:$4 sm:$0xff]  }
 0x173   :  { %3389 = vmatpush1.bf16.msra.mxu0 %v5752_v44  ;;  %v5826_v44 = vld [vmem:[%s8075_s1 + $0x2a4] ss:$40 sps:$4 sm:$0xff]  }
 0x174   :  { %3430 = vmatpush1.bf16.msra.mxu1 %v5755_v45  ;;  %3390 = vmatprep.subr.bf16.mxu0 %v5760_v46  ;;  %v5829_v45 = vld [vmem:[%s8075_s1 + $0x7a4] ss:$40 sps:$4 sm:$0xff]   ;;  %v5824_v46 = vld [vmem:[%s8075_s1 + $0x2a0] ss:$40 sps:$4 sm:$0xff]  }
 0x175   :  { %3431 = vmatprep.subr.bf16.mxu1 %v5763_v48  ;;  %v5827_v48 = vld [vmem:[%s8075_s1 + $0x7a0] ss:$40 sps:$4 sm:$0xff]  }
 0x177   :  { %3391 = vmatpush1.bf16.msra.mxu0 %v5758_v49  ;;  %v5832_v49 = vld [vmem:[%s8075_s1 + $0x2f4] ss:$40 sps:$4 sm:$0xff]  }
 0x178   :  { %3432 = vmatpush1.bf16.msra.mxu1 %v5761_v50  ;;  %3392 = vmatprep.subr.bf16.mxu0 %v5766_v52  ;;  %v5835_v50 = vld [vmem:[%s8075_s1 + $0x7f4] ss:$40 sps:$4 sm:$0xff]   ;;  %v5830_v52 = vld [vmem:[%s8075_s1 + $0x2f0] ss:$40 sps:$4 sm:$0xff]  }
 0x179   :  { %3433 = vmatprep.subr.bf16.mxu1 %v5769_v53  ;;  %v5833_v53 = vld [vmem:[%s8075_s1 + $0x7f0] ss:$40 sps:$4 sm:$0xff]  }
 0x17b   :  { %3393 = vmatpush1.bf16.msra.mxu0 %v5764_v54  ;;  %v5838_v54 = vld [vmem:[%s8075_s1 + $0x344] ss:$40 sps:$4 sm:$0xff]  }
 0x17c   :  { %3434 = vmatpush1.bf16.msra.mxu1 %v5767_v55  ;;  %3394 = vmatprep.subr.bf16.mxu0 %v5772_v56  ;;  %v5841_v55 = vld [vmem:[%s8075_s1 + $0x844] ss:$40 sps:$4 sm:$0xff]   ;;  %v5836_v56 = vld [vmem:[%s8075_s1 + $0x340] ss:$40 sps:$4 sm:$0xff]  }
 0x17d   :  { %3435 = vmatprep.subr.bf16.mxu1 %v5775_v57  ;;  %v5839_v57 = vld [vmem:[%s8075_s1 + $0x840] ss:$40 sps:$4 sm:$0xff]  }
 0x17f   :  { %3395 = vmatpush1.bf16.msra.mxu0 %v5770_v59  ;;  %v5844_v59 = vld [vmem:[%s8075_s1 + $0x394] ss:$40 sps:$4 sm:$0xff]  }
 0x180   :  { %3436 = vmatpush1.bf16.msra.mxu1 %v5773_v60  ;;  %3446 = vmatprep.subr.bf16.mxu0 %v5778_v62  ;;  %v5847_v60 = vld [vmem:[%s8075_s1 + $0x894] ss:$40 sps:$4 sm:$0xff]   ;;  %v5842_v62 = vld [vmem:[%s8075_s1 + $0x390] ss:$40 sps:$4 sm:$0xff]  }
 0x181   :  { %3487 = vmatprep.subr.bf16.mxu1 %v5781_v63  ;;  %v5845_v63 = vld [vmem:[%s8075_s1 + $0x890] ss:$40 sps:$4 sm:$0xff]  }
 0x182   :  { %3397 = vmatmul.mubr.bf16.vlgmr.msra.gmra.mrb[20].mxu0 %v6175_v7 }
 0x183   :  { %3438 = vmatmul.mubr.bf16.vlgmr.msra.gmra.mrb[20].mxu1 %v6384_v14  ;;  %3447 = vmatpush1.bf16.msra.mxu0 %v5776_v0  ;;  %v5850_v0 = vld [vmem:[%s8075_s1 + $0x3e4] ss:$40 sps:$4 sm:$0xff]  }
 0x184   :  { %3488 = vmatpush1.bf16.msra.mxu1 %v5779_v1  ;;  %3448 = vmatprep.subr.bf16.mxu0 %v5784_v2  ;;  %v5853_v1 = vld [vmem:[%s8075_s1 + $0x8e4] ss:$40 sps:$4 sm:$0xff]   ;;  %v3606_v2 = vlaneseq }
 0x185   :  { %3489 = vmatprep.subr.bf16.mxu1 %v5787_v3  ;;  %3478 = vmatprep.mubr.bf16.mxu0 %v6104_v47  ;;  %v5799_v47 = vld [vmem:[%s8075_s1 + $0x614] ss:$40 sps:$4 sm:$0xff]   ;;  %v5848_v3 = vld [vmem:[%s8075_s1 + $0x3e0] ss:$40 sps:$4 sm:$0xff]  }
 0x186   :  { %3519 = vmatprep.mubr.bf16.mxu1 %v6115_v51  ;;  %v5794_v51 = vld [vmem:[%s8075_s1 + $0x110] ss:$40 sps:$4 sm:$0xff]  }
 0x187   :  { %3449 = vmatpush1.bf16.msra.mxu0 %v5782_v4  ;;  %v5851_v4 = vld [vmem:[%s8075_s1 + $0x8e0] ss:$40 sps:$4 sm:$0xff]  }
 0x188   :  { %3490 = vmatpush1.bf16.msra.mxu1 %v5785_v5  ;;  %3450 = vmatprep.subr.bf16.mxu0 %v5790_v8  ;;  %v5856_v5 = vld [vmem:[%s8075_s1 + $0x434] ss:$40 sps:$4 sm:$0xff]  }
 0x189   :  { %3491 = vmatprep.subr.bf16.mxu1 %v5793_v9  ;;  %v5859_v8 = vld [vmem:[%s8075_s1 + $0x934] ss:$40 sps:$4 sm:$0xff]   ;;  %v7350_v9 = vshrl.u32 %v3606_v2, 7 }
 0x18a   :  { %v3703_v2 = vld [vmem:[%s8078_s2 + $0xd8] sm:$0xff] }
 0x18b   :  { %3451 = vmatpush1.bf16.msra.mxu0 %v5788_v10  ;;  %v5854_v10 = vld [vmem:[%s8075_s1 + $0x430] ss:$40 sps:$4 sm:$0xff]  }
 0x18c   :  { %3492 = vmatpush1.bf16.msra.mxu1 %v5791_v13  ;;  %3452 = vmatprep.subr.bf16.mxu0 %v5796_v17  ;;  %v5857_v13 = vld [vmem:[%s8075_s1 + $0x930] ss:$40 sps:$4 sm:$0xff]   ;;  %v5862_v17 = vld [vmem:[%s8075_s1 + $0x484] ss:$40 sps:$4 sm:$0xff]  }
 0x18d   :  { %3493 = vmatprep.subr.bf16.mxu1 %v5799_v47  ;;  %v5865_v47 = vld [vmem:[%s8075_s1 + $0x984] ss:$40 sps:$4 sm:$0xff]  }
 0x18f   :  { %3453 = vmatpush1.bf16.msra.mxu0 %v5794_v51  ;;  %v3612_v51 = vsub.s32 1, %v7350_v9 }
 0x190   :  { %3494 = vmatpush1.bf16.msra.mxu1 %v5797_v18  ;;  %3454 = vmatprep.subr.bf16.mxu0 %v5802_v19  ;;  %v7368_v18 = vld [vmem:[%s8077_s4] sm:$0xff] }
 0x191   :  { %3495 = vmatprep.subr.bf16.mxu1 %v5805_v20  ;;  %v5860_v19 = vld [vmem:[%s8075_s1 + $0x480] ss:$40 sps:$4 sm:$0xff]  }
 0x192   :  { %v5863_v20 = vld [vmem:[%s8075_s1 + $0x980] ss:$40 sps:$4 sm:$0xff]  }
 0x193   :  { %3455 = vmatpush1.bf16.msra.mxu0 %v5800_v58  ;;  %v5868_v58 = vld [vmem:[%s8075_s1 + $0x4d4] ss:$40 sps:$4 sm:$0xff]  }
 0x194   :  { %3496 = vmatpush1.bf16.msra.mxu1 %v5803_v61  ;;  %3456 = vmatprep.subr.bf16.mxu0 %v5808_v21  ;;  %v5871_v61 = vld [vmem:[%s8075_s1 + $0x9d4] ss:$40 sps:$4 sm:$0xff]   ;;  %v3692_v21 = vld [vmem:[%s8078_s2 + $0x80] sm:$0xff] }
 0x195   :  { %3497 = vmatprep.subr.bf16.mxu1 %v5811_v22  ;;  %v3152_v27 = vpop.f32.mrb[8].mxu0  ;;  %v3693_v22 = vld [vmem:[%s8078_s2 + $0x88] sm:$0xff] }
 0x196   :  { %v3193_v28 = vpop.f32.mrb[8].mxu1  ;;  %v3153_v29 = vadd.f32 %v3152_v27, %v7054_v11  ;;  %v3154_v30 = vpop.f32.mrb[9].mxu0  ;;  %v5820_v11 = vld [vmem:[%s8075_s1 + $0x254] ss:$40 sps:$4 sm:$0xff]   ;;  %v5007_v27 = vpack.c.bf16 %v3693_v22, %v3692_v21  ;;  %v3688_v22 = vld [vmem:[%s8078_s2 + $0x60] sm:$0xff] }
 0x197   :  { %v3195_v31 = vpop.f32.mrb[9].mxu1  ;;  %v3155_v32 = vadd.f32 %v3154_v30, %v7059_v15  ;;  %v3156_v33 = vpop.f32.mrb[10].mxu0  ;;  %3457 = vmatpush1.bf16.msra.mxu0 %v5806_v23  ;;  %v5823_v15 = vld [vmem:[%s8075_s1 + $0x754] ss:$40 sps:$4 sm:$0xff]   ;;  %v3613_v23 = vrot.slane %v7368_v18, %v3612_v51 }
 0x198   :  { %3498 = vmatpush1.bf16.msra.mxu1 %v5809_v24  ;;  %v3197_v37 = vpop.f32.mrb[10].mxu1  ;;  %v7268_v38 = vadd.f32 %v3193_v28, %v3153_v29  ;;  %v3157_v39 = vpop.f32.mrb[11].mxu0  ;;  %3458 = vmatprep.subr.bf16.mxu0 %v5814_v25  ;;  %v5866_v24 = vld [vmem:[%s8075_s1 + $0x4d0] ss:$40 sps:$4 sm:$0xff]   ;;  %v3676_v28 = vld [vmem:[%s8078_s2] sm:$0xff]  ;;  %v3677_v29 = vld [vmem:[%s8078_s2 + $0x8] sm:$0xff] }
 0x199   :  { %3499 = vmatprep.subr.bf16.mxu1 %v5817_v26  ;;  %v3198_v40 = vpop.f32.mrb[11].mxu1  ;;  %v7276_v41 = vadd.f32 %v3195_v31, %v3155_v32  ;;  %v5869_v25 = vld [vmem:[%s8075_s1 + $0x9d0] ss:$40 sps:$4 sm:$0xff]   ;;  %v5874_v26 = vld [vmem:[%s8075_s1 + $0xa24] ss:$40 sps:$4 sm:$0xff]   ;;  %v3657_v30 = vadd.f32 %v3613_v23, %v7062_v16 }
 0x19a   :  { %v3694_v31 = vld [vmem:[%s8078_s2 + $0x90] sm:$0xff]  ;;  %v3695_v32 = vld [vmem:[%s8078_s2 + $0x98] sm:$0xff]  ;;  %v5872_v33 = vld [vmem:[%s8075_s1 + $0xa20] ss:$40 sps:$4 sm:$0xff]  }
 0x19b   :  { %3459 = vmatpush1.bf16.msra.mxu0 %v5812_v35  ;;  %v5009_v35 = vpack.c.bf16 %v3677_v29, %v3676_v28  ;;  %v5877_v16 = vld [vmem:[%s8075_s1 + $0xa74] ss:$40 sps:$4 sm:$0xff]   ;;  %v5011_v39 = vpack.c.bf16 %v3695_v32, %v3694_v31  ;;  %v3667_v40 = vmax.f32 %v3657_v30, 0.0  ;;  %v3689_v23 = vld [vmem:[%s8078_s2 + $0x68] sm:$0xff]  ;;  %v3620_v28 = vsub.s32 3, %v7350_v9 }
 0x19c   :  { %3500 = vmatpush1.bf16.msra.mxu1 %v5815_v36  ;;  %3460 = vmatprep.subr.bf16.mxu0 %v5820_v11  ;;  %v3678_v36 = vld [vmem:[%s8078_s2 + $0x10] sm:$0xff]  ;;  %v3679_v37 = vld [vmem:[%s8078_s2 + $0x18] sm:$0xff]  ;;  %v3696_v11 = vld [vmem:[%s8078_s2 + $0xa0] sm:$0xff] }
 0x19d   :  { %3501 = vmatprep.subr.bf16.mxu1 %v5823_v15  ;;  %v3697_v15 = vld [vmem:[%s8078_s2 + $0xa8] sm:$0xff] }
 0x19f   :  { %3461 = vmatpush1.bf16.msra.mxu0 %v5818_v42  ;;  %v5875_v42 = vld [vmem:[%s8075_s1 + $0xa70] ss:$40 sps:$4 sm:$0xff]  }
 0x1a0   :  { %3502 = vmatpush1.bf16.msra.mxu1 %v5821_v43  ;;  %3462 = vmatprep.subr.bf16.mxu0 %v5826_v44  ;;  %v5013_v43 = vpack.c.bf16 %v3679_v37, %v3678_v36  ;;  %v5880_v44 = vld [vmem:[%s8075_s1 + $0xac4] ss:$40 sps:$4 sm:$0xff]  }
 0x1a1   :  { %3503 = vmatprep.subr.bf16.mxu1 %v5829_v45  ;;  %v5015_v45 = vpack.c.bf16 %v3697_v15, %v3696_v11  ;;  %v5895_v11 = vld [vmem:[%s8075_s1 + $0xc54] ss:$40 sps:$4 sm:$0xff]  }
 0x1a3   :  { %3463 = vmatpush1.bf16.msra.mxu0 %v5824_v46  ;;  %v3698_v46 = vld [vmem:[%s8078_s2 + $0xb0] sm:$0xff] }
 0x1a4   :  { %3504 = vmatpush1.bf16.msra.mxu1 %v5827_v48  ;;  %3464 = vmatprep.subr.bf16.mxu0 %v5832_v49  ;;  %v3699_v48 = vld [vmem:[%s8078_s2 + $0xb8] sm:$0xff]  ;;  %v5878_v49 = vld [vmem:[%s8075_s1 + $0xac0] ss:$40 sps:$4 sm:$0xff]  }
 0x1a5   :  { %3505 = vmatprep.subr.bf16.mxu1 %v5835_v50 }
 0x1a7   :  { %3465 = vmatpush1.bf16.msra.mxu0 %v5830_v52  ;;  %v5883_v52 = vld [vmem:[%s8075_s1 + $0xb14] ss:$40 sps:$4 sm:$0xff]  }
 0x1a8   :  { %3506 = vmatpush1.bf16.msra.mxu1 %v5833_v53  ;;  %3466 = vmatprep.subr.bf16.mxu0 %v5838_v54  ;;  %v5019_v53 = vpack.c.bf16 %v3699_v48, %v3698_v46  ;;  %v3682_v54 = vld [vmem:[%s8078_s2 + $0x30] sm:$0xff] }
 0x1a9   :  { %3507 = vmatprep.subr.bf16.mxu1 %v5841_v55  ;;  %v3700_v55 = vld [vmem:[%s8078_s2 + $0xc0] sm:$0xff] }
 0x1ab   :  { %3467 = vmatpush1.bf16.msra.mxu0 %v5836_v56  ;;  %v3701_v56 = vld [vmem:[%s8078_s2 + $0xc8] sm:$0xff] }
 0x1ac   :  { %3508 = vmatpush1.bf16.msra.mxu1 %v5839_v57  ;;  %3468 = vmatprep.subr.bf16.mxu0 %v5844_v59  ;;  %v5881_v57 = vld [vmem:[%s8075_s1 + $0xb10] ss:$40 sps:$4 sm:$0xff]  }
 0x1ad   :  { %3509 = vmatprep.subr.bf16.mxu1 %v5847_v60  ;;  %v5886_v60 = vld [vmem:[%s8075_s1 + $0xb64] ss:$40 sps:$4 sm:$0xff]  }
 0x1af   :  { %3469 = vmatpush1.bf16.msra.mxu0 %v5842_v62  ;;  %v5023_v62 = vpack.c.bf16 %v3701_v56, %v3700_v55  ;;  %v5896_v55 = vld [vmem:[%s8075_s1 + $0xca0] ss:$40 sps:$4 sm:$0xff]  }
 0x1b0   :  { %3510 = vmatpush1.bf16.msra.mxu1 %v5845_v63  ;;  %3470 = vmatprep.subr.bf16.mxu0 %v5850_v0  ;;  %v3684_v63 = vld [vmem:[%s8078_s2 + $0x40] sm:$0xff]  ;;  %v3685_v0 = vld [vmem:[%s8078_s2 + $0x48] sm:$0xff] }
 0x1b1   :  { %3511 = vmatprep.subr.bf16.mxu1 %v5853_v1  ;;  %v3702_v1 = vld [vmem:[%s8078_s2 + $0xd0] sm:$0xff] }
 0x1b3   :  { %3471 = vmatpush1.bf16.msra.mxu0 %v5848_v3  ;;  %v5884_v3 = vld [vmem:[%s8075_s1 + $0xb60] ss:$40 sps:$4 sm:$0xff]  }
 0x1b4   :  { %3512 = vmatpush1.bf16.msra.mxu1 %v5851_v4  ;;  %3472 = vmatprep.subr.bf16.mxu0 %v5856_v5  ;;  %v5025_v4 = vpack.c.bf16 %v3685_v0, %v3684_v63  ;;  %v5889_v5 = vld [vmem:[%s8075_s1 + $0xbb4] ss:$40 sps:$4 sm:$0xff]   ;;  %v3728_v63 = vld [vmem:[%s8078_s2 + $0x1a0] sm:$0xff]  ;;  %v3729_v0 = vld [vmem:[%s8078_s2 + $0x1a8] sm:$0xff] }
 0x1b5   :  { %3513 = vmatprep.subr.bf16.mxu1 %v5859_v8  ;;  %v5027_v8 = vpack.c.bf16 %v3703_v2, %v3702_v1  ;;  %v5899_v2 = vld [vmem:[%s8075_s1 + $0xcf0] ss:$40 sps:$4 sm:$0xff]  }
 0x1b7   :  { %3473 = vmatpush1.bf16.msra.mxu0 %v5854_v10  ;;  %v3686_v10 = vld [vmem:[%s8078_s2 + $0x50] sm:$0xff] }
 0x1b8   :  { %3514 = vmatpush1.bf16.msra.mxu1 %v5857_v13  ;;  %3474 = vmatprep.subr.bf16.mxu0 %v5862_v17  ;;  %v3687_v13 = vld [vmem:[%s8078_s2 + $0x58] sm:$0xff]  ;;  %v3704_v17 = vld [vmem:[%s8078_s2 + $0xe0] sm:$0xff] }
 0x1b9   :  { %3515 = vmatprep.subr.bf16.mxu1 %v5865_v47  ;;  %v3705_v47 = vld [vmem:[%s8078_s2 + $0xe8] sm:$0xff] }
 0x1ba   :  { %v5031_v21 = vpack.c.bf16 %v3705_v47, %v3704_v17  ;;  %v3731_v17 = vld [vmem:[%s8078_s2 + $0x1b8] sm:$0xff]  ;;  %v5902_v47 = vld [vmem:[%s8075_s1 + $0xd40] ss:$40 sps:$4 sm:$0xff]  }
 0x1bb   :  { %3475 = vmatpush1.bf16.msra.mxu0 %v5860_v19  ;;  %v5887_v19 = vld [vmem:[%s8075_s1 + $0xbb0] ss:$40 sps:$4 sm:$0xff]  }
 0x1bc   :  { %3516 = vmatpush1.bf16.msra.mxu1 %v5863_v20  ;;  %3476 = vmatprep.subr.bf16.mxu0 %v5868_v58  ;;  %v5029_v20 = vpack.c.bf16 %v3687_v13, %v3686_v10  ;;  %v3608_v58 = vsub.s32 0, %v7350_v9  ;;  %v3713_v10 = vld [vmem:[%s8078_s2 + $0x128] sm:$0xff]  ;;  %v3730_v13 = vld [vmem:[%s8078_s2 + $0x1b0] sm:$0xff] }
 0x1bd   :  { %3517 = vmatprep.subr.bf16.mxu1 %v5871_v61  ;;  %v5892_v61 = vld [vmem:[%s8075_s1 + $0xc04] ss:$40 sps:$4 sm:$0xff]  }
 0x1be   :  { %v3609_v37 = vrot.slane %v7368_v18, %v3608_v58 }
 0x1bf   :  { %3477 = vmatpush1.bf16.msra.mxu0 %v5866_v24 }
 0x1c0   :  { %3518 = vmatpush1.bf16.msra.mxu1 %v5869_v25  ;;  %3528 = vmatprep.subr.bf16.mxu0 %v5874_v26  ;;  %v3706_v26 = vld [vmem:[%s8078_s2 + $0xf0] sm:$0xff]  ;;  %v3656_v48 = vadd.f32 %v3609_v37, %v7057_v12 }
 0x1c1   :  { %5008 = vmatprep.subr.bf16.mxu1 %v5007_v27  ;;  %v3707_v27 = vld [vmem:[%s8078_s2 + $0xf8] sm:$0xff]  ;;  %v3726_v12 = vld [vmem:[%s8078_s2 + $0x190] sm:$0xff] }
 0x1c2   :  { %3479 = vmatmul.mubr.bf16.vlgmr.msra.gmra.mrb[24].mxu0 %v6173_v6  ;;  %v3680_v6 = vld [vmem:[%s8078_s2 + $0x20] sm:$0xff]  ;;  %v5035_v15 = vpack.c.bf16 %v3707_v27, %v3706_v26  ;;  %v5913_v37 = vld [vmem:[%s8075_s1 + $0xe34] ss:$40 sps:$4 sm:$0xff]  }
 0x1c3   :  { %3520 = vmatmul.mubr.bf16.vlgmr.msra.gmra.mrb[24].mxu1 %v6175_v7  ;;  %3529 = vmatpush1.bf16.msra.mxu0 %v5872_v33  ;;  %v3681_v7 = vld [vmem:[%s8078_s2 + $0x28] sm:$0xff] }
 0x1c4   :  { %5010 = vmatpush3.bf16.msra.mxu1 %v5009_v35  ;;  %3907 = vmatprep.mubr.f32.mxu1 %v3667_v40  ;;  %v5017_v50 = vpack.c.bf16 %v3681_v7, %v3680_v6  ;;  %v5890_v35 = vld [vmem:[%s8075_s1 + $0xc00] ss:$40 sps:$4 sm:$0xff]   ;;  %v3690_v40 = vld [vmem:[%s8078_s2 + $0x70] sm:$0xff]  ;;  %v3621_v6 = vrot.slane %v7368_v18, %v3620_v28  ;;  %v5910_v27 = vld [vmem:[%s8075_s1 + $0xde4] ss:$40 sps:$4 sm:$0xff]  }
 0x1c5   :  { %3530 = vmatprep.subr.bf16.mxu0 %v5877_v16  ;;  %5012 = vmatprep.subr.bf16.mxu1 %v5011_v39  ;;  %v5033_v16 = vpack.c.bf16 %v3689_v23, %v3688_v22  ;;  %v5893_v7 = vld [vmem:[%s8075_s1 + $0xc50] ss:$40 sps:$4 sm:$0xff]   ;;  %v3732_v23 = vld [vmem:[%s8078_s2 + $0x1c0] sm:$0xff] }
 0x1c6   :  { %3560 = vmatprep.mubr.bf16.mxu0 %v6262_v34  ;;  %v3683_v34 = vld [vmem:[%s8078_s2 + $0x38] sm:$0xff] }
 0x1c7   :  { %3531 = vmatpush1.bf16.msra.mxu0 %v5875_v42  ;;  %v5021_v59 = vpack.c.bf16 %v3683_v34, %v3682_v54  ;;  %v3691_v42 = vld [vmem:[%s8078_s2 + $0x78] sm:$0xff]  ;;  %v3659_v54 = vadd.f32 %v3621_v6, %v7276_v41  ;;  %v5916_v6 = vld [vmem:[%s8075_s1 + $0xe84] ss:$40 sps:$4 sm:$0xff]  }
 0x1c8   :  { %5014 = vmatpush3.bf16.msra.mxu1 %v5013_v43  ;;  %3532 = vmatprep.subr.bf16.mxu0 %v5880_v44  ;;  %v3724_v44 = vld [vmem:[%s8078_s2 + $0x180] sm:$0xff]  ;;  %v5037_v46 = vpack.c.bf16 %v3691_v42, %v3690_v40  ;;  %v3727_v34 = vld [vmem:[%s8078_s2 + $0x198] sm:$0xff]  ;;  %v3737_v42 = vld [vmem:[%s8078_s2 + $0x1e8] sm:$0xff] }
 0x1c9   :  { %5016 = vmatprep.subr.bf16.mxu1 %v5015_v45  ;;  %v3725_v45 = vld [vmem:[%s8078_s2 + $0x188] sm:$0xff]  ;;  %v5901_v41 = vld [vmem:[%s8075_s1 + $0xcf4] ss:$40 sps:$4 sm:$0xff]   ;;  %v3669_v1 = vmax.f32 %v3659_v54, 0.0  ;;  %v3736_v40 = vld [vmem:[%s8078_s2 + $0x1e0] sm:$0xff] }
 0x1ca   :  { %v3715_v22 = vld [vmem:[%s8078_s2 + $0x138] sm:$0xff] }
 0x1cb   :  { %3533 = vmatpush1.bf16.msra.mxu0 %v5878_v49  ;;  %v5898_v49 = vld [vmem:[%s8075_s1 + $0xca4] ss:$40 sps:$4 sm:$0xff]   ;;  %v5919_v54 = vld [vmem:[%s8075_s1 + $0xed4] ss:$40 sps:$4 sm:$0xff]  }
 0x1cc   :  { %5018 = vmatpush3.bf16.msra.mxu1 %v5017_v50  ;;  %3534 = vmatprep.subr.bf16.mxu0 %v5883_v52  ;;  %v5039_v50 = vpack.c.bf16 %v3725_v45, %v3724_v44  ;;  %v3708_v52 = vld [vmem:[%s8078_s2 + $0x100] sm:$0xff]  ;;  %v3616_v45 = vsub.s32 2, %v7350_v9 }
 0x1cd   :  { %5020 = vmatprep.subr.bf16.mxu1 %v5019_v53  ;;  %v3709_v53 = vld [vmem:[%s8078_s2 + $0x108] sm:$0xff] }
 0x1ce   :  { %v5041_v56 = vpack.c.bf16 %v3709_v53, %v3708_v52  ;;  %v5914_v52 = vld [vmem:[%s8075_s1 + $0xe80] ss:$40 sps:$4 sm:$0xff]  }
 0x1cf   :  { %3535 = vmatpush1.bf16.msra.mxu0 %v5881_v57  ;;  %v3666_v57 = vmax.f32 %v3656_v48, 0.0  ;;  %v3721_v48 = vld [vmem:[%s8078_s2 + $0x168] sm:$0xff] }
 0x1d0   :  { %5022 = vmatpush3.bf16.msra.mxu1 %v5021_v59  ;;  %3536 = vmatprep.subr.bf16.mxu0 %v5886_v60  ;;  %v3710_v59 = vld [vmem:[%s8078_s2 + $0x110] sm:$0xff]  ;;  %v3711_v60 = vld [vmem:[%s8078_s2 + $0x118] sm:$0xff] }
 0x1d1   :  { %5024 = vmatprep.subr.bf16.mxu1 %v5023_v62  ;;  %v5043_v62 = vpack.c.bf16 %v3727_v34, %v3726_v12  ;;  %v3617_v12 = vrot.slane %v7368_v18, %v3616_v45  ;;  %v3747_v45 = vld [vmem:[%s8078_s2 + $0x238] sm:$0xff] }
 0x1d3   :  { %3537 = vmatpush1.bf16.msra.mxu0 %v5884_v3  ;;  %v5045_v3 = vpack.c.bf16 %v3711_v60, %v3710_v59  ;;  %v3788_v59 = vld [vmem:[%s8078_s2 + $0x380] sm:$0xff]  ;;  %v3789_v60 = vld [vmem:[%s8078_s2 + $0x388] sm:$0xff] }
 0x1d4   :  { %5026 = vmatpush3.bf16.msra.mxu1 %v5025_v4  ;;  %3538 = vmatprep.subr.bf16.mxu0 %v5889_v5  ;;  %v5904_v4 = vld [vmem:[%s8075_s1 + $0xd44] ss:$40 sps:$4 sm:$0xff]   ;;  %v5047_v5 = vpack.c.bf16 %v3729_v0, %v3728_v63 }
 0x1d5   :  { %5028 = vmatprep.subr.bf16.mxu1 %v5027_v8  ;;  %v3234_v24 = vpop.f32.mrb[12].mxu0  ;;  %v3712_v8 = vld [vmem:[%s8078_s2 + $0x120] sm:$0xff] }
 0x1d6   :  { %v3275_v25 = vpop.f32.mrb[12].mxu1  ;;  %v3236_v30 = vpop.f32.mrb[13].mxu0  ;;  %v3740_v0 = vld [vmem:[%s8078_s2 + $0x200] sm:$0xff] }
 0x1d7   :  { %v7526_v29 = vadd.f32 %v3275_v25, %v3234_v24  ;;  %v3277_v31 = vpop.f32.mrb[13].mxu1  ;;  %v3238_v33 = vpop.f32.mrb[14].mxu0  ;;  %3539 = vmatpush1.bf16.msra.mxu0 %v5887_v19  ;;  %v5049_v19 = vpack.c.bf16 %v3713_v10, %v3712_v8  ;;  %v3733_v24 = vld [vmem:[%s8078_s2 + $0x1c8] sm:$0xff]  ;;  %v5905_v25 = vld [vmem:[%s8075_s1 + $0xd90] ss:$40 sps:$4 sm:$0xff]   ;;  %v3772_v8 = vld [vmem:[%s8078_s2 + $0x300] sm:$0xff] }
 0x1d8   :  { %v7528_v32 = vadd.f32 %v3277_v31, %v3236_v30  ;;  %5030 = vmatpush3.bf16.msra.mxu1 %v5029_v20  ;;  %v3279_v36 = vpop.f32.mrb[14].mxu1  ;;  %v3239_v39 = vpop.f32.mrb[15].mxu0  ;;  %3540 = vmatprep.subr.bf16.mxu0 %v5892_v61  ;;  %v5907_v20 = vld [vmem:[%s8075_s1 + $0xd94] ss:$40 sps:$4 sm:$0xff]   ;;  %v5051_v61 = vpack.c.bf16 %v3731_v17, %v3730_v13  ;;  %v5055_v28 = vpack.c.bf16 %v3733_v24, %v3732_v23  ;;  %v3716_v30 = vld [vmem:[%s8078_s2 + $0x140] sm:$0xff]  ;;  %v3717_v31 = vld [vmem:[%s8078_s2 + $0x148] sm:$0xff] }
 0x1d9   :  { %5032 = vmatprep.subr.bf16.mxu1 %v5031_v21  ;;  %v3280_v43 = vpop.f32.mrb[15].mxu1  ;;  %v3714_v21 = vld [vmem:[%s8078_s2 + $0x130] sm:$0xff]  ;;  %v5057_v36 = vpack.c.bf16 %v3717_v31, %v3716_v30  ;;  %v3773_v10 = vld [vmem:[%s8078_s2 + $0x308] sm:$0xff]  ;;  %v3791_v17 = vld [vmem:[%s8078_s2 + $0x398] sm:$0xff] }
 0x1da   :  { %v5053_v26 = vpack.c.bf16 %v3715_v22, %v3714_v21  ;;  %v3734_v33 = vld [vmem:[%s8078_s2 + $0x1d0] sm:$0xff]  ;;  %v3760_v23 = vld [vmem:[%s8078_s2 + $0x2a0] sm:$0xff]  ;;  %v3793_v30 = vld [vmem:[%s8078_s2 + $0x3a8] sm:$0xff] }
 0x1db   :  { %3541 = vmatpush1.bf16.msra.mxu0 %v5890_v35  ;;  %v3735_v35 = vld [vmem:[%s8078_s2 + $0x1d8] sm:$0xff]  ;;  %v3790_v13 = vld [vmem:[%s8078_s2 + $0x390] sm:$0xff] }
 0x1dc   :  { %5034 = vmatpush3.bf16.msra.mxu1 %v5033_v16  ;;  %3542 = vmatprep.subr.bf16.mxu0 %v5895_v11  ;;  %v5908_v16 = vld [vmem:[%s8075_s1 + $0xde0] ss:$40 sps:$4 sm:$0xff]   ;;  %v5059_v39 = vpack.c.bf16 %v3735_v35, %v3734_v33  ;;  %v3718_v11 = vld [vmem:[%s8078_s2 + $0x150] sm:$0xff]  ;;  %v5107_v24 = vpack.c.bf16 %v3791_v17, %v3790_v13  ;;  %v3783_v17 = vld [vmem:[%s8078_s2 + $0x358] sm:$0xff] }
 0x1dd   :  { %5036 = vmatprep.subr.bf16.mxu1 %v5035_v15  ;;  %v3719_v15 = vld [vmem:[%s8078_s2 + $0x158] sm:$0xff]  ;;  %v3744_v33 = vld [vmem:[%s8078_s2 + $0x220] sm:$0xff]  ;;  %v3745_v35 = vld [vmem:[%s8078_s2 + $0x228] sm:$0xff] }
 0x1de   :  { %v5911_v43 = vld [vmem:[%s8075_s1 + $0xe30] ss:$40 sps:$4 sm:$0xff]   ;;  %v5061_v44 = vpack.c.bf16 %v3719_v15, %v3718_v11  ;;  %v3777_v11 = vld [vmem:[%s8078_s2 + $0x328] sm:$0xff] }
 0x1df   :  { %3543 = vmatpush1.bf16.msra.mxu0 %v5893_v7  ;;  %v5063_v7 = vpack.c.bf16 %v3737_v42, %v3736_v40  ;;  %v3763_v15 = vld [vmem:[%s8078_s2 + $0x2b8] sm:$0xff]  ;;  %v3794_v40 = vld [vmem:[%s8078_s2 + $0x3b0] sm:$0xff] }
 0x1e0   :  { %5038 = vmatpush3.bf16.msra.mxu1 %v5037_v46  ;;  %3544 = vmatprep.subr.bf16.mxu0 %v5898_v49  ;;  %v3720_v46 = vld [vmem:[%s8078_s2 + $0x160] sm:$0xff]  ;;  %v3738_v49 = vld [vmem:[%s8078_s2 + $0x1f0] sm:$0xff]  ;;  %v3795_v42 = vld [vmem:[%s8078_s2 + $0x3b8] sm:$0xff] }
 0x1e1   :  { %5040 = vmatprep.subr.bf16.mxu1 %v5039_v50  ;;  %v3739_v50 = vld [vmem:[%s8078_s2 + $0x1f8] sm:$0xff]  ;;  %v5065_v53 = vpack.c.bf16 %v3721_v48, %v3720_v46  ;;  %v3764_v46 = vld [vmem:[%s8078_s2 + $0x2c0] sm:$0xff]  ;;  %v5115_v48 = vpack.c.bf16 %v3795_v42, %v3794_v40  ;;  %v3782_v13 = vld [vmem:[%s8078_s2 + $0x350] sm:$0xff] }
 0x1e2   :  { %v5067_v34 = vpack.c.bf16 %v3739_v50, %v3738_v49  ;;  %v3778_v49 = vld [vmem:[%s8078_s2 + $0x330] sm:$0xff]  ;;  %v3779_v50 = vld [vmem:[%s8078_s2 + $0x338] sm:$0xff] }
 0x1e3   :  { %3908 = vmatmul.mubr.f32.vlgmr.msra.gmra.mrb[28].mxu1 %v3666_v57  ;;  %3545 = vmatpush1.bf16.msra.mxu0 %v5896_v55  ;;  %v3722_v55 = vld [vmem:[%s8078_s2 + $0x170] sm:$0xff]  ;;  %v3756_v57 = vld [vmem:[%s8078_s2 + $0x280] sm:$0xff] }
 0x1e4   :  { %5042 = vmatpush3.bf16.msra.mxu1 %v5041_v56  ;;  %3977 = vmatprep.mubr.f32.mxu1 %v3669_v1  ;;  %v3723_v56 = vld [vmem:[%s8078_s2 + $0x178] sm:$0xff]  ;;  %v3741_v1 = vld [vmem:[%s8078_s2 + $0x208] sm:$0xff] }
 0x1e5   :  { %3546 = vmatprep.subr.bf16.mxu0 %v5901_v41  ;;  %5044 = vmatprep.subr.bf16.mxu1 %v5043_v62  ;;  %v3757_v41 = vld [vmem:[%s8078_s2 + $0x288] sm:$0xff]  ;;  %v5917_v62 = vld [vmem:[%s8075_s1 + $0xed0] ss:$40 sps:$4 sm:$0xff]   ;;  %v5069_v63 = vpack.c.bf16 %v3723_v56, %v3722_v55  ;;  %v5117_v56 = vpack.c.bf16 %v3779_v50, %v3778_v49 }
 0x1e6   :  { %v3749_v55 = vld [vmem:[%s8078_s2 + $0x248] sm:$0xff]  ;;  %v3786_v50 = vld [vmem:[%s8078_s2 + $0x370] sm:$0xff] }
 0x1e7   :  { %3547 = vmatpush1.bf16.msra.mxu0 %v5899_v2  ;;  %v3658_v2 = vadd.f32 %v3617_v12, %v7268_v38  ;;  %v3759_v38 = vld [vmem:[%s8078_s2 + $0x298] sm:$0xff] }
 0x1e8   :  { %5046 = vmatpush3.bf16.msra.mxu1 %v5045_v3  ;;  %3548 = vmatprep.subr.bf16.mxu0 %v5904_v4  ;;  %v5071_v3 = vpack.c.bf16 %v3757_v41, %v3756_v57  ;;  %v3758_v4 = vld [vmem:[%s8078_s2 + $0x290] sm:$0xff] }
 0x1e9   :  { %5048 = vmatprep.subr.bf16.mxu1 %v5047_v5  ;;  %v5103_v5 = vpack.c.bf16 %v3789_v60, %v3788_v59  ;;  %v3668_v21 = vmax.f32 %v3658_v2, 0.0  ;;  %v5075_v22 = vpack.c.bf16 %v3759_v38, %v3758_v4  ;;  %v3766_v41 = vld [vmem:[%s8078_s2 + $0x2d0] sm:$0xff]  ;;  %v3780_v60 = vld [vmem:[%s8078_s2 + $0x340] sm:$0xff]  ;;  %v3751_v4 = vld [vmem:[%s8078_s2 + $0x258] sm:$0xff] }
 0x1eb   :  { %3549 = vmatpush1.bf16.msra.mxu0 %v5902_v47  ;;  %v5073_v47 = vpack.c.bf16 %v3741_v1, %v3740_v0  ;;  %v3798_v0 = vld [vmem:[%s8078_s2 + $0x3d0] sm:$0xff]  ;;  %v3799_v1 = vld [vmem:[%s8078_s2 + $0x3d8] sm:$0xff] }
 0x1ec   :  { %5050 = vmatpush3.bf16.msra.mxu1 %v5049_v19  ;;  %3550 = vmatprep.subr.bf16.mxu0 %v5907_v20  ;;  %v3742_v19 = vld [vmem:[%s8078_s2 + $0x210] sm:$0xff]  ;;  %v3743_v20 = vld [vmem:[%s8078_s2 + $0x218] sm:$0xff]  ;;  %v5123_v38 = vpack.c.bf16 %v3799_v1, %v3798_v0 }
 0x1ed   :  { %5052 = vmatprep.subr.bf16.mxu1 %v5051_v61  ;;  %v5105_v61 = vpack.c.bf16 %v3773_v10, %v3772_v8  ;;  %v5077_v31 = vpack.c.bf16 %v3743_v20, %v3742_v19  ;;  %v3768_v10 = vld [vmem:[%s8078_s2 + $0x2e0] sm:$0xff]  ;;  %v3769_v19 = vld [vmem:[%s8078_s2 + $0x2e8] sm:$0xff]  ;;  %v3823_v0 = vld [vmem:[%s8078_s2 + $0x498] sm:$0xff] }
 0x1ee   :  { %v3800_v20 = vld [vmem:[%s8078_s2 + $0x3e0] sm:$0xff] }
 0x1ef   :  { %3551 = vmatpush1.bf16.msra.mxu0 %v5905_v25  ;;  %v3774_v25 = vld [vmem:[%s8078_s2 + $0x310] sm:$0xff] }
 0x1f0   :  { %5054 = vmatpush3.bf16.msra.mxu1 %v5053_v26  ;;  %3552 = vmatprep.subr.bf16.mxu0 %v5910_v27  ;;  %v3775_v26 = vld [vmem:[%s8078_s2 + $0x318] sm:$0xff]  ;;  %v3761_v27 = vld [vmem:[%s8078_s2 + $0x2a8] sm:$0xff] }
 0x1f1   :  { %5056 = vmatprep.subr.bf16.mxu1 %v5055_v28  ;;  %v3792_v28 = vld [vmem:[%s8078_s2 + $0x3a0] sm:$0xff] }
 0x1f3   :  { %3553 = vmatpush1.bf16.msra.mxu0 %v5908_v16  ;;  %v5109_v16 = vpack.c.bf16 %v3775_v26, %v3774_v25  ;;  %v3624_v25 = vsub.s32 4, %v7350_v9  ;;  %v5095_v26 = vpack.c.bf16 %v3769_v19, %v3768_v10  ;;  %v3827_v19 = vld [vmem:[%s8078_s2 + $0x4b8] sm:$0xff] }
 0x1f4   :  { %5058 = vmatpush3.bf16.msra.mxu1 %v5057_v36  ;;  %3554 = vmatprep.subr.bf16.mxu0 %v5913_v37  ;;  %v5079_v36 = vpack.c.bf16 %v3761_v27, %v3760_v23  ;;  %v3762_v37 = vld [vmem:[%s8078_s2 + $0x2b0] sm:$0xff]  ;;  %v3753_v23 = vld [vmem:[%s8078_s2 + $0x268] sm:$0xff] }
 0x1f5   :  { %5060 = vmatprep.subr.bf16.mxu1 %v5059_v39  ;;  %v3776_v39 = vld [vmem:[%s8078_s2 + $0x320] sm:$0xff]  ;;  %v3770_v27 = vld [vmem:[%s8078_s2 + $0x2f0] sm:$0xff] }
 0x1f7   :  { %3555 = vmatpush1.bf16.msra.mxu0 %v5911_v43  ;;  %v5081_v43 = vpack.c.bf16 %v3745_v35, %v3744_v33 }
 0x1f8   :  { %5062 = vmatpush3.bf16.msra.mxu1 %v5061_v44  ;;  %3556 = vmatprep.subr.bf16.mxu0 %v5916_v6  ;;  %v3746_v44 = vld [vmem:[%s8078_s2 + $0x230] sm:$0xff]  ;;  %v5113_v6 = vpack.c.bf16 %v3777_v11, %v3776_v39 }
 0x1f9   :  { %5064 = vmatprep.subr.bf16.mxu1 %v5063_v7  ;;  %v5083_v7 = vpack.c.bf16 %v3763_v15, %v3762_v37  ;;  %v5085_v12 = vpack.c.bf16 %v3747_v45, %v3746_v44  ;;  %v3802_v37 = vld [vmem:[%s8078_s2 + $0x3f0] sm:$0xff] }
 0x1fa   :  { %v3754_v44 = vld [vmem:[%s8078_s2 + $0x270] sm:$0xff] }
 0x1fb   :  { %3557 = vmatpush1.bf16.msra.mxu0 %v5914_v52  ;;  %v3765_v52 = vld [vmem:[%s8078_s2 + $0x2c8] sm:$0xff] }
 0x1fc   :  { %5066 = vmatpush3.bf16.msra.mxu1 %v5065_v53  ;;  %3558 = vmatprep.subr.bf16.mxu0 %v5919_v54  ;;  %v3796_v53 = vld [vmem:[%s8078_s2 + $0x3c0] sm:$0xff]  ;;  %v3797_v54 = vld [vmem:[%s8078_s2 + $0x3c8] sm:$0xff]  ;;  %v5087_v57 = vpack.c.bf16 %v3765_v52, %v3764_v46  ;;  %v3787_v52 = vld [vmem:[%s8078_s2 + $0x378] sm:$0xff] }
 0x1fd   :  { %5068 = vmatprep.subr.bf16.mxu1 %v5067_v34  ;;  %v3748_v34 = vld [vmem:[%s8078_s2 + $0x240] sm:$0xff]  ;;  %v5119_v59 = vpack.c.bf16 %v3797_v54, %v3796_v53 }
 0x1fe   :  { %v5089_v2 = vpack.c.bf16 %v3749_v55, %v3748_v34  ;;  %v5133_v34 = vpack.c.bf16 %v3787_v52, %v3786_v50 }
 0x1ff   :  { %3559 = vmatpush1.bf16.msra.mxu0 %v5917_v62  ;;  %v3781_v62 = vld [vmem:[%s8078_s2 + $0x348] sm:$0xff] }
 0x200   :  { %5070 = vmatpush3.bf16.msra.mxu1 %v5069_v63  ;;  %5072 = vmatprep.subr.bf16.mxu0 %v5071_v3  ;;  %v3767_v63 = vld [vmem:[%s8078_s2 + $0x2d8] sm:$0xff]  ;;  %v3750_v3 = vld [vmem:[%s8078_s2 + $0x250] sm:$0xff] }
 0x201   :  { %5104 = vmatprep.subr.bf16.mxu1 %v5103_v5  ;;  %v5121_v5 = vpack.c.bf16 %v3781_v62, %v3780_v60  ;;  %v5091_v8 = vpack.c.bf16 %v3767_v63, %v3766_v41  ;;  %v3821_v41 = vld [vmem:[%s8078_s2 + $0x488] sm:$0xff]  ;;  %v3822_v63 = vld [vmem:[%s8078_s2 + $0x490] sm:$0xff] }
 0x202   :  { %3561 = vmatmul.mubr.bf16.vlgmr.msra.gmra.mrb[28].mxu0 %v6384_v14  ;;  %v5111_v14 = vpack.c.bf16 %v3793_v30, %v3792_v28  ;;  %v3784_v30 = vld [vmem:[%s8078_s2 + $0x360] sm:$0xff]  ;;  %v3805_v62 = vld [vmem:[%s8078_s2 + $0x408] sm:$0xff] }
 0x203   :  { %3978 = vmatmul.mubr.f32.vlgmr.msra.gmra.mrb[30].mxu1 %v3668_v21  ;;  %5074 = vmatpush3.bf16.msra.mxu0 %v5073_v47  ;;  %v3628_v47 = vsub.s32 5, %v7350_v9  ;;  %v5093_v21 = vpack.c.bf16 %v3751_v4, %v3750_v3  ;;  %v3806_v3 = vld [vmem:[%s8078_s2 + $0x410] sm:$0xff]  ;;  %v3807_v4 = vld [vmem:[%s8078_s2 + $0x418] sm:$0xff] }
 0x204   :  { %5106 = vmatpush3.bf16.msra.mxu1 %v5105_v61  ;;  %5076 = vmatprep.subr.bf16.mxu0 %v5075_v22  ;;  %v3801_v61 = vld [vmem:[%s8078_s2 + $0x3e8] sm:$0xff]  ;;  %v3752_v22 = vld [vmem:[%s8078_s2 + $0x260] sm:$0xff]  ;;  %v5141_v10 = vpack.c.bf16 %v3807_v4, %v3806_v3 }
 0x205   :  { %5108 = vmatprep.subr.bf16.mxu1 %v5107_v24  ;;  %v5125_v24 = vpack.c.bf16 %v3783_v17, %v3782_v13  ;;  %v5127_v28 = vpack.c.bf16 %v3801_v61, %v3800_v20  ;;  %v3629_v35 = vrot.slane %v7368_v18, %v3628_v47  ;;  %v3808_v13 = vld [vmem:[%s8078_s2 + $0x420] sm:$0xff]  ;;  %v3809_v17 = vld [vmem:[%s8078_s2 + $0x428] sm:$0xff]  ;;  %v3826_v47 = vld [vmem:[%s8078_s2 + $0x4b0] sm:$0xff] }
 0x206   :  { %v5145_v20 = vpack.c.bf16 %v3809_v17, %v3808_v13  ;;  %v5147_v61 = vpack.c.bf16 %v3827_v19, %v3826_v47 }
 0x207   :  { %5078 = vmatpush3.bf16.msra.mxu0 %v5077_v31  ;;  %v3785_v31 = vld [vmem:[%s8078_s2 + $0x368] sm:$0xff] }
 0x208   :  { %5110 = vmatpush3.bf16.msra.mxu1 %v5109_v16  ;;  %5080 = vmatprep.subr.bf16.mxu0 %v5079_v36  ;;  %v3771_v16 = vld [vmem:[%s8078_s2 + $0x2f8] sm:$0xff] }
 0x209   :  { %5112 = vmatprep.subr.bf16.mxu1 %v5111_v14  ;;  %v3803_v14 = vld [vmem:[%s8078_s2 + $0x3f8] sm:$0xff] }
 0x20a   :  { %v5131_v49 = vpack.c.bf16 %v3803_v14, %v3802_v37  ;;  %v3815_v37 = vld [vmem:[%s8078_s2 + $0x458] sm:$0xff] }
 0x20b   :  { %5082 = vmatpush3.bf16.msra.mxu0 %v5081_v43  ;;  %v5097_v43 = vpack.c.bf16 %v3753_v23, %v3752_v22  ;;  %v3811_v22 = vld [vmem:[%s8078_s2 + $0x438] sm:$0xff]  ;;  %v3828_v23 = vld [vmem:[%s8078_s2 + $0x4c0] sm:$0xff] }
 0x20c   :  { %5114 = vmatpush3.bf16.msra.mxu1 %v5113_v6  ;;  %5084 = vmatprep.subr.bf16.mxu0 %v5083_v7  ;;  %v5129_v6 = vpack.c.bf16 %v3785_v31, %v3784_v30  ;;  %v3625_v7 = vrot.slane %v7368_v18, %v3624_v25  ;;  %v3830_v30 = vld [vmem:[%s8078_s2 + $0x4d0] sm:$0xff]  ;;  %v3831_v31 = vld [vmem:[%s8078_s2 + $0x4d8] sm:$0xff] }
 0x20d   :  { %5116 = vmatprep.subr.bf16.mxu1 %v5115_v48  ;;  %v3755_v48 = vld [vmem:[%s8078_s2 + $0x278] sm:$0xff] }
 0x20f   :  { %5086 = vmatpush3.bf16.msra.mxu0 %v5085_v12  ;;  %v5101_v12 = vpack.c.bf16 %v3755_v48, %v3754_v44 }
 0x210   :  { %5118 = vmatpush3.bf16.msra.mxu1 %v5117_v56  ;;  %5088 = vmatprep.subr.bf16.mxu0 %v5087_v57  ;;  %v3820_v57 = vld [vmem:[%s8078_s2 + $0x480] sm:$0xff] }
 0x211   :  { %5120 = vmatprep.subr.bf16.mxu1 %v5119_v59  ;;  %v3804_v59 = vld [vmem:[%s8078_s2 + $0x400] sm:$0xff]  ;;  %v5135_v60 = vpack.c.bf16 %v3821_v41, %v3820_v57 }
 0x212   :  { %v5137_v1 = vpack.c.bf16 %v3805_v62, %v3804_v59 }
 0x213   :  { %5090 = vmatpush3.bf16.msra.mxu0 %v5089_v2  ;;  %v5139_v2 = vpack.c.bf16 %v3823_v0, %v3822_v63 }
 0x214   :  { %5122 = vmatpush3.bf16.msra.mxu1 %v5121_v5  ;;  %5092 = vmatprep.subr.bf16.mxu0 %v5091_v8  ;;  %v3824_v5 = vld [vmem:[%s8078_s2 + $0x4a0] sm:$0xff]  ;;  %v3825_v8 = vld [vmem:[%s8078_s2 + $0x4a8] sm:$0xff] }
 0x215   :  { %5124 = vmatprep.subr.bf16.mxu1 %v5123_v38  ;;  %v3316_v33 = vpop.f32.mrb[16].mxu0  ;;  %v5143_v38 = vpack.c.bf16 %v3825_v8, %v3824_v5 }
 0x216   :  { %v7876_v36 = vpop.f32.mrb[16].mxu1  ;;  %v3317_v39 = vadd.f32 %v3316_v33, %v7526_v29  ;;  %v3318_v11 = vpop.f32.mrb[17].mxu0  ;;  %v5099_v29 = vpack.c.bf16 %v3771_v16, %v3770_v27  ;;  %v3812_v27 = vld [vmem:[%s8078_s2 + $0x440] sm:$0xff]  ;;  %v3814_v16 = vld [vmem:[%s8078_s2 + $0x450] sm:$0xff] }
 0x217   :  { %v7885_v15 = vpop.f32.mrb[17].mxu1  ;;  %v3319_v40 = vadd.f32 %v3318_v11, %v7528_v32  ;;  %v3320_v42 = vpop.f32.mrb[18].mxu0  ;;  %5094 = vmatpush3.bf16.msra.mxu0 %v5093_v21  ;;  %v3810_v21 = vld [vmem:[%s8078_s2 + $0x430] sm:$0xff]  ;;  %v5157_v14 = vpack.c.bf16 %v3815_v37, %v3814_v16  ;;  %v3636_v11 = vsub.s32 7, %v7350_v9  ;;  %v4202_v16 = vld [vmem:[%s8079_s3 + $0x40] sm:$0xff]  ;;  %v4203_v37 = vld [vmem:[%s8079_s3 + $0x48] sm:$0xff] }
 0x218   :  { %v3361_v45 = vpop.f32.mrb[18].mxu1  ;;  %5126 = vmatpush3.bf16.msra.mxu1 %v5125_v24  ;;  %v3321_v46 = vpop.f32.mrb[19].mxu0  ;;  %5096 = vmatprep.subr.bf16.mxu0 %v5095_v26  ;;  %v3660_v55 = vadd.f32 %v3625_v7, %v3317_v39  ;;  %v3829_v24 = vld [vmem:[%s8078_s2 + $0x4c8] sm:$0xff]  ;;  %v5149_v25 = vpack.c.bf16 %v3811_v22, %v3810_v21  ;;  %v3632_v39 = vsub.s32 6, %v7350_v9  ;;  %v4194_v21 = vld [vmem:[%s8079_s3] sm:$0xff] }
 0x219   :  { %v3362_v32 = vpop.f32.mrb[19].mxu1  ;;  %5128 = vmatprep.subr.bf16.mxu1 %v5127_v28  ;;  %v3661_v53 = vadd.f32 %v3629_v35, %v3319_v40  ;;  %v5151_v26 = vpack.c.bf16 %v3829_v24, %v3828_v23  ;;  %v3813_v28 = vld [vmem:[%s8078_s2 + $0x448] sm:$0xff]  ;;  %v5155_v35 = vpack.c.bf16 %v3831_v31, %v3830_v30  ;;  %v3832_v40 = vld [vmem:[%s8078_s2 + $0x4e0] sm:$0xff]  ;;  %v4196_v23 = vld [vmem:[%s8079_s3 + $0x10] sm:$0xff] }
 0x21a   :  { %v3670_v56 = vmax.f32 %v3660_v55, 0.0  ;;  %v5153_v33 = vpack.c.bf16 %v3813_v28, %v3812_v27  ;;  %v3833_v42 = vld [vmem:[%s8078_s2 + $0x4e8] sm:$0xff]  ;;  %v3633_v48 = vrot.slane %v7368_v18, %v3632_v39  ;;  %v4198_v27 = vld [vmem:[%s8079_s3 + $0x20] sm:$0xff]  ;;  %v4200_v31 = vld [vmem:[%s8079_s3 + $0x30] sm:$0xff] }
 0x21b   :  { %v3671_v54 = vmax.f32 %v3661_v53, 0.0  ;;  %5098 = vmatpush3.bf16.msra.mxu0 %v5097_v43  ;;  %v5159_v45 = vpack.c.bf16 %v3833_v42, %v3832_v40  ;;  %v3817_v7 = vld [vmem:[%s8078_s2 + $0x468] sm:$0xff]  ;;  %v3637_v53 = vrot.slane %v7368_v18, %v3636_v11  ;;  %v3818_v18 = vld [vmem:[%s8078_s2 + $0x470] sm:$0xff]  ;;  %v4205_v11 = vld [vmem:[%s8079_s3 + $0x58] sm:$0xff] }
 0x21c   :  { %5130 = vmatpush3.bf16.msra.mxu1 %v5129_v6  ;;  %5100 = vmatprep.subr.bf16.mxu0 %v5099_v29  ;;  %v3816_v6 = vld [vmem:[%s8078_s2 + $0x460] sm:$0xff]  ;;  %v4195_v22 = vld [vmem:[%s8079_s3 + $0x8] sm:$0xff]  ;;  %v4204_v39 = vld [vmem:[%s8079_s3 + $0x50] sm:$0xff] }
 0x21d   :  { %5132 = vmatprep.subr.bf16.mxu1 %v5131_v49  ;;  %4047 = vmatprep.mubr.f32.mxu0 %v3671_v54  ;;  %v5161_v49 = vpack.c.bf16 %v3817_v7, %v3816_v6  ;;  %v5168_v24 = vpack.c.bf16 %v4195_v22, %v4194_v21  ;;  %v4199_v28 = vld [vmem:[%s8079_s3 + $0x28] sm:$0xff]  ;;  %v5183_v40 = vpack.c.bf16 %v4205_v11, %v4204_v39 }
 0x21e   :  { %v5174_v30 = vpack.c.bf16 %v4199_v28, %v4198_v27  ;;  %v3603_v42 = vld [vmem:[%s8077_s4 + $0x8] sm:$0x3] }
 0x21f   :  { %5102 = vmatpush3.bf16.msra.mxu0 %v5101_v12  ;;  %v3645_v7 = vrot.slane %v3603_v42, %v3612_v51  ;;  %v4206_v51 = vld [vmem:[%s8079_s3 + $0x60] sm:$0xff] }
 0x220   :  { %5134 = vmatpush3.bf16.msra.mxu1 %v5133_v34  ;;  %5136 = vmatprep.subr.bf16.mxu0 %v5135_v60 }
 0x222   :  { %4048 = vmatmul.mubr.f32.vlgmr.msra.gmra.mrb[32].mxu0 %v3670_v56  ;;  %v3835_v56 = vld [vmem:[%s8078_s2 + $0x4f8] sm:$0xff] }
 0x223   :  { %5138 = vmatpush3.bf16.msra.mxu0 %v5137_v1 }
 0x224   :  { %5140 = vmatprep.subr.bf16.mxu0 %v5139_v2 }
 0x227   :  { %5142 = vmatpush3.bf16.msra.mxu0 %v5141_v10 }
 0x228   :  { %5144 = vmatprep.subr.bf16.mxu0 %v5143_v38 }
 0x22b   :  { %5146 = vmatpush3.bf16.msra.mxu0 %v5145_v20 }
 0x22c   :  { %5148 = vmatprep.subr.bf16.mxu0 %v5147_v61  ;;  %v5920_v61 = vmov 0.0|0.0  }
 0x22d   :  { %5167 = vmatprep.subr.bf16.mxu1 %v5920_v61 }
 0x22f   :  { %5150 = vmatpush3.bf16.msra.mxu0 %v5149_v25  ;;  %v4197_v25 = vld [vmem:[%s8079_s3 + $0x18] sm:$0xff] }
 0x230   :  { %5152 = vmatprep.subr.bf16.mxu0 %v5151_v26  ;;  %v5171_v26 = vpack.c.bf16 %v4197_v25, %v4196_v23 }
 0x233   :  { %5154 = vmatpush3.bf16.msra.mxu0 %v5153_v33  ;;  %v4201_v33 = vld [vmem:[%s8079_s3 + $0x38] sm:$0xff] }
 0x234   :  { %5156 = vmatprep.subr.bf16.mxu0 %v5155_v35  ;;  %v5177_v35 = vpack.c.bf16 %v4201_v33, %v4200_v31 }
 0x237   :  { %5158 = vmatpush3.bf16.msra.mxu0 %v5157_v14  ;;  %v5180_v14 = vpack.c.bf16 %v4203_v37, %v4202_v16 }
 0x238   :  { %5160 = vmatprep.subr.bf16.mxu0 %v5159_v45 }
 0x23b   :  { %5162 = vmatpush3.bf16.msra.mxu0 %v5161_v49 }
 0x255   :  { %v3398_v43 = vpop.f32.mrb[20].mxu0 }
 0x256   :  { %v3439_v44 = vpop.f32.mrb[20].mxu1  ;;  %v3399_v46 = vadd.f32 %v3398_v43, %v7876_v36  ;;  %v3400_v29 = vpop.f32.mrb[21].mxu0  ;;  %v3834_v36 = vld [vmem:[%s8078_s2 + $0x4f0] sm:$0xff]  ;;  %v4778_v43 = vld [vmem:[%s8080_s5] ss:$0 sm:$0xff] }
 0x257   :  { %v3441_v32 = vpop.f32.mrb[21].mxu1  ;;  %v3401_v50 = vadd.f32 %v3400_v29, %v7885_v15  ;;  %v3402_v52 = vpop.f32.mrb[22].mxu0  ;;  %v5163_v41 = vpack.c.bf16 %v3835_v56, %v3834_v36  ;;  %v3819_v15 = vld [vmem:[%s8078_s2 + $0x478] sm:$0xff] }
 0x258   :  { %v3443_v54 = vpop.f32.mrb[22].mxu1  ;;  %v3440_v12 = vadd.f32 %v3439_v44, %v3399_v46  ;;  %v3403_v34 = vpop.f32.mrb[23].mxu0  ;;  %v5165_v60 = vpack.c.bf16 %v3819_v15, %v3818_v18  ;;  %v3641_v44 = vrot.slane %v3603_v42, %v3608_v58 }
 0x259   :  { %v3444_v55 = vpop.f32.mrb[23].mxu1  ;;  %v3442_v57 = vadd.f32 %v3441_v32, %v3401_v50  ;;  %5164 = vmatprep.subr.bf16.mxu0 %v5163_v41  ;;  %v4207_v41 = vld [vmem:[%s8079_s3 + $0x68] sm:$0xff] }
 0x25a   :  { %v3662_v59 = vadd.f32 %v3633_v48, %v3440_v12  ;;  %5166 = vmatpush3.bf16.msra.mxu0 %v5165_v60  ;;  %v5186_v18 = vpack.c.bf16 %v4207_v41, %v4206_v51  ;;  %v4208_v60 = vld [vmem:[%s8079_s3 + $0x70] sm:$0xff] }
 0x25b   :  { %v3663_v62 = vadd.f32 %v3637_v53, %v3442_v57 }
 0x25c   :  { %v3672_v0 = vmax.f32 %v3662_v59, 0.0 }
 0x25d   :  { %v3673_v63 = vmax.f32 %v3663_v62, 0.0  ;;  %v4209_v62 = vld [vmem:[%s8079_s3 + $0x78] sm:$0xff] }
 0x25f   :  { %4117 = vmatprep.mubr.f32.mxu1 %v3673_v63 }
 0x260   :  { %4118 = vmatmul.mubr.f32.vlgmr.msra.gmra.mrb[32].mxu1 %v3672_v0  ;;  %v5189_v0 = vpack.c.bf16 %v4209_v62, %v4208_v60 }
 0x261   :  { %5169 = vmatpush3.bf16.msra.mxu1 %v5168_v24 }
 0x262   :  { %5170 = vmatprep.subr.bf16.mxu1 %v5920_v61 }
 0x265   :  { %5172 = vmatpush3.bf16.msra.mxu1 %v5171_v26 }
 0x266   :  { %5173 = vmatprep.subr.bf16.mxu1 %v5920_v61 }
 0x269   :  { %5175 = vmatpush3.bf16.msra.mxu1 %v5174_v30 }
 0x26a   :  { %5176 = vmatprep.subr.bf16.mxu1 %v5920_v61 }
 0x26d   :  { %5178 = vmatpush3.bf16.msra.mxu1 %v5177_v35 }
 0x26e   :  { %5179 = vmatprep.subr.bf16.mxu1 %v5920_v61 }
 0x271   :  { %5181 = vmatpush3.bf16.msra.mxu1 %v5180_v14 }
 0x272   :  { %5182 = vmatprep.subr.bf16.mxu1 %v5920_v61 }
 0x275   :  { %5184 = vmatpush3.bf16.msra.mxu1 %v5183_v40 }
 0x276   :  { %5185 = vmatprep.subr.bf16.mxu1 %v5920_v61 }
 0x279   :  { %5187 = vmatpush3.bf16.msra.mxu1 %v5186_v18 }
 0x27a   :  { %5188 = vmatprep.subr.bf16.mxu1 %v5920_v61 }
 0x27d   :  { %5190 = vmatpush3.bf16.msra.mxu1 %v5189_v0 }
 0x295   :  { %v3480_v1 = vpop.f32.mrb[24].mxu0 }
 0x296   :  { %v3521_v2 = vpop.f32.mrb[24].mxu1  ;;  %v3482_v4 = vpop.f32.mrb[25].mxu0 }
 0x297   :  { %v3522_v3 = vadd.f32 %v3521_v2, %v3480_v1  ;;  %v3523_v5 = vpop.f32.mrb[25].mxu1  ;;  %v3484_v10 = vpop.f32.mrb[26].mxu0  ;;  %v5922_v2 = vmov 0.0  }
 0x298   :  { %v3524_v8 = vadd.f32 %v3523_v5, %v3482_v4  ;;  %v3525_v38 = vpop.f32.mrb[26].mxu1  ;;  %v3485_v13 = vpop.f32.mrb[27].mxu0  ;;  %5004 = vmatprep.mubr.msk.f32.mxu1 %vm5921_vm0, %v5922_v2 }
 0x299   :  { %v3526_v17 = vpop.f32.mrb[27].mxu1  ;;  %v4779_v38 = vld [vmem:[%s8081_s6] ss:$0 sm:$0xff] }
 0x2b6   :  { %v4812_v47 = vpop.f32.mrb[28].mxu1 }
 0x2b7   :  { %v4813_v19 = vpop.f32.mrb[29].mxu1 }
 0x2b8   :  { %v4814_v20 = vadd.f32 %v4813_v19, %v4812_v47 }
 0x2ba   :  { %v3910_v32 = vadd.f32 %v4814_v20, %v4778_v43 }
 0x2d5   :  { %v3562_v45 = vpop.f32.mrb[28].mxu0 }
 0x2d6   :  { %v4847_v6 = vpop.f32.mrb[30].mxu1  ;;  %v3563_v46 = vadd.f32 %v3562_v45, %v3522_v3  ;;  %v3564_v29 = vpop.f32.mrb[29].mxu0 }
 0x2d7   :  { %v4848_v48 = vpop.f32.mrb[31].mxu1  ;;  %v3565_v49 = vadd.f32 %v3564_v29, %v3524_v8  ;;  %v3566_v52 = vpop.f32.mrb[30].mxu0 }
 0x2d8   :  { %v4849_v50 = vadd.f32 %v4848_v48, %v4847_v6  ;;  %v3664_v53 = vadd.f32 %v3641_v44, %v3563_v46  ;;  %v3567_v54 = vpop.f32.mrb[31].mxu0 }
 0x2d9   :  { %v3665_v12 = vadd.f32 %v3645_v7, %v3565_v49 }
 0x2da   :  { %v3980_v34 = vadd.f32 %v4849_v50, %v3910_v32  ;;  %v3674_v36 = vmax.f32 %v3664_v53, 0.0 }
 0x2db   :  { %v3675_v55 = vmax.f32 %v3665_v12, 0.0 }
 0x2dd   :  { %4187 = vmatprep.mubr.f32.mxu0 %v3675_v55 }
 0x2de   :  { %4188 = vmatmul.mubr.f32.vlgmr.msra.gmra.mrb[34].mxu0 %v3674_v36 }
 0x2f5   :  { %v4882_v58 = vpop.f32.mrb[32].mxu0 }
 0x2f6   :  { %v4883_v56 = vpop.f32.mrb[33].mxu0 }
 0x2f7   :  { %v4884_v57 = vadd.f32 %v4883_v56, %v4882_v58 }
 0x2f9   :  { %v4050_v9 = vadd.f32 %v4884_v57, %v3980_v34 }
 0x333   :  { %v4917_v15 = vpop.f32.mrb[32].mxu1 }
 0x334   :  { %v4918_v59 = vpop.f32.mrb[33].mxu1 }
 0x335   :  { %v4919_v63 = vadd.f32 %v4918_v59, %v4917_v15 }
 0x337   :  { %v4120_v1 = vadd.f32 %v4919_v63, %v4050_v9 }
 0x3b1   :  { %v4952_v3 = vpop.f32.mrb[34].mxu0 }
 0x3b2   :  { %v4953_v4 = vpop.f32.mrb[35].mxu0 }
 0x3b3   :  { %v4954_v5 = vadd.f32 %v4953_v4, %v4952_v3 }
 0x3b5   :  { %v4190_v8 = vadd.f32 %v4954_v5, %v4120_v1 }
 0x3b7   :  { %v4193_v10 = vmax.f32 %v4190_v8, 0.0 }
 0x3b9   :  { %5005 = vmatmul.mubr.f32.vlgmr.msra.gmra.mrb[34].mxu1 %v4193_v10 }
 0x48c   :  { %v4283_v13 = vpop.f32.mrb[34].mxu1 }
 0x48d   :  { %v4284_v17 = vadd.f32 %v4779_v38, %v4283_v13  ;;  %v5006_v47 = vpop.f32.mrb[35].mxu1 }
 0x48f   :  { %4287 = vst [vmem:[%s8082_s7] sm:$0xff] %v4284_v17 }

</bundles_post_ra>
